<compile_context>
chip_gen: v7x
topology: tpu7x:2x2x1
jax: 0.10.0
libtpu: 0.0.40
codegen_flags: <defaults>
</compile_context>

<pallas_src>
import functools
import math

import jax
import jax.numpy as jnp
from jax.experimental import pallas as pl
from jax.experimental.pallas import tpu as pltpu

EPS = 1e-5


def _cdiv(a, b):
    return (a + b - 1) // b


def _round_up(x, m):
    return (x + m - 1) // m * m


# ---------------------------------------------------------------------------
# Fused matmul + bias + residual + ReLU kernel (the hot path)
# ---------------------------------------------------------------------------
def _fused_matmul_kernel(use_res, relu, *refs):
    if use_res:
        a_ref, w_ref, b_ref, r_ref, o_ref = refs
    else:
        a_ref, w_ref, b_ref, o_ref = refs
        r_ref = None

    k = pl.program_id(2)

    @pl.when(k == 0)
    def _():
        o_ref[...] = jnp.zeros_like(o_ref)

    # bf16 x bf16 MXU matmul, f32 accumulation directly into the output block
    # (output block index is constant along k, so it stays resident in VMEM).
    o_ref[...] += jnp.dot(a_ref[...], w_ref[...],
                          preferred_element_type=jnp.float32)

    @pl.when(k == pl.num_programs(2) - 1)
    def _():
        y = o_ref[...] + b_ref[...]
        if use_res:
            y = y + r_ref[...]
        if relu:
            y = jnp.maximum(y, 0.0)
        o_ref[...] = y


def fused_matmul_bias(a_bf16, w_bf16, bias_row, residual=None, relu=True):
    """a: (M, Kp) bf16; w: (Kp, N) bf16 (BN scale folded in, K zero-padded);
    bias_row: (1, N) f32; residual: (M, N) f32 or None.  Returns (M, N) f32."""
    M, Kp = a_bf16.shape
    Kp2, Nc = w_bf16.shape
    assert Kp == Kp2 and Kp % 128 == 0, (Kp, Kp2)

    # Adaptive tiling (perf feedback): large M tiles, K tile matched to Kp,
    # N split into lane-aligned tiles so a second TensorCore gets work on v7x.
    TM = M if M <= 512 else 512
    if Nc % 256 == 0 and Nc > 256:
        TN = 256
    elif Nc % 128 == 0 and Nc > 128:
        TN = 128
    else:
        TN = Nc
    if Kp <= 1024:
        TK = Kp
    elif Kp % 512 == 0:
        TK = 512
    elif Kp % 256 == 0:
        TK = 256
    else:
        TK = 128

    grid = (_cdiv(M, TM), _cdiv(Nc, TN), Kp // TK)

    use_res = residual is not None
    inputs = [a_bf16, w_bf16, bias_row]
    in_specs = [
        pl.BlockSpec((TM, TK), lambda i, j, k: (i, k)),
        pl.BlockSpec((TK, TN), lambda i, j, k: (k, j)),
        pl.BlockSpec((1, TN), lambda i, j, k: (0, j)),
    ]
    if use_res:
        inputs.append(residual)
        in_specs.append(pl.BlockSpec((TM, TN), lambda i, j, k: (i, j)))

    return pl.pallas_call(
        functools.partial(_fused_matmul_kernel, use_res, relu),
        out_shape=jax.ShapeDtypeStruct((M, Nc), jnp.float32),
        grid_spec=pltpu.PrefetchScalarGridSpec(
            num_scalar_prefetch=0,
            grid=grid,
            in_specs=in_specs,
            out_specs=pl.BlockSpec((TM, TN), lambda i, j, k: (i, j)),
        ),
        compiler_params=pltpu.CompilerParams(
            dimension_semantics=("parallel", "parallel", "arbitrary")),
    )(*inputs)


# ---------------------------------------------------------------------------
# Conv = im2col (bf16, fused under jit) + fused Pallas matmul
# ---------------------------------------------------------------------------
def _im2col(x, kh, kw, stride, pad):
    N, H, W, C = x.shape
    if pad > 0:
        x = jnp.pad(x, ((0, 0), (pad, pad), (pad, pad), (0, 0)))
    OH = (H + 2 * pad - kh) // stride + 1
    OW = (W + 2 * pad - kw) // stride + 1
    cols = []
    for dy in range(kh):
        for dx in range(kw):
            v = x[:, dy:dy + stride * (OH - 1) + 1:stride,
                  dx:dx + stride * (OW - 1) + 1:stride, :]
            cols.append(v)
    patches = jnp.concatenate(cols, axis=-1)          # (N, OH, OW, kh*kw*C)
    patches = patches.reshape(N * OH * OW, kh * kw * C).astype(jnp.bfloat16)
    return patches, OH, OW


def conv_bn(x, wmat, bias_row, kh, kw, stride, pad, relu, residual=None):
    """x: NHWC f32; wmat: (Kp, Cout) bf16 prepared at param-build time."""
    n = x.shape[0]
    cols, OH, OW = _im2col(x, kh, kw, stride, pad)
    K = cols.shape[1]
    Kp, cout = wmat.shape
    if Kp > K:  # zero-pad only the K (reduction) axis — fused by XLA under jit
        cols = jnp.pad(cols, ((0, 0), (0, Kp - K)))
    res2d = None
    if residual is not None:
        res2d = residual.reshape(-1, residual.shape[-1]).astype(jnp.float32)
    out = fused_matmul_bias(cols, wmat, bias_row, residual=res2d, relu=relu)
    return out.reshape(n, OH, OW, cout)


# ---------------------------------------------------------------------------
# Residual block forward (jitted end-to-end)
# ---------------------------------------------------------------------------
@functools.partial(jax.jit, static_argnames=("stride", "use_1x1"))
def residual_forward(x_nchw, kparams, stride, use_1x1):
    x = jnp.transpose(x_nchw, (0, 2, 3, 1)).astype(jnp.float32)  # -> NHWC
    # Y = relu(bn1(conv1(X)))
    y = conv_bn(x, kparams['w1'], kparams['b1'], 3, 3, stride, 1, relu=True)
    # shortcut
    if use_1x1:
        sc = conv_bn(x, kparams['w3'], kparams['b3'], 1, 1, stride, 0,
                     relu=False)
    else:
        sc = x
    # Y = relu(bn2(conv2(Y)) + shortcut)   (residual add + relu fused in-kernel)
    y = conv_bn(y, kparams['w2'], kparams['b2'], 3, 3, 1, 1, relu=True,
                residual=sc)
    return jnp.transpose(y, (0, 3, 1, 2))  # back to NCHW (PyTorch layout)


# ---------------------------------------------------------------------------
# Deterministic parameters; BN folding + weight layout done once at build time
# ---------------------------------------------------------------------------
class ParamGen:
    def __init__(self, seed=0):
        self._key = jax.random.PRNGKey(seed)

    def normal(self, shape):
        self._key, k = jax.random.split(self._key)
        return jax.random.normal(k, shape, dtype=jnp.float32)


def _make_raw_conv(pg, cin, cout, k):
    w = pg.normal((cout, cin, k, k)) / math.sqrt(cin * k * k)  # OIHW
    b = pg.normal((cout,)) * 0.01
    return w, b


def _make_raw_bn(pg, c):
    return dict(gamma=1.0 + 0.1 * pg.normal((c,)),
                beta=0.01 * pg.normal((c,)),
                mean=0.01 * pg.normal((c,)),
                var=1.0 + 0.05 * jnp.abs(pg.normal((c,))))


def _prep_conv(w_oihw, conv_b, bn=None):
    """Fold eval-mode BN into the weight matrix and bias; pre-transpose to
    (K, Cout), zero-pad K to a multiple of 128, cast to bf16. Done ONCE."""
    cout, cin, kh, kw = w_oihw.shape
    if bn is not None:
        scale = bn['gamma'] / jnp.sqrt(bn['var'] + EPS)
        bias = bn['beta'] + (conv_b - bn['mean']) * scale
    else:
        scale = jnp.ones((cout,), jnp.float32)
        bias = conv_b
    K = kh * kw * cin
    wmat = jnp.transpose(w_oihw, (2, 3, 1, 0)).reshape(K, cout) * scale[None, :]
    Kp = _round_up(K, 128)
    wmat = jnp.pad(wmat, ((0, Kp - K), (0, 0))).astype(jnp.bfloat16)
    return wmat, bias.reshape(1, cout).astype(jnp.float32)


def make_residual_params(pg, cin, cout, use_1x1):
    w1, cb1 = _make_raw_conv(pg, cin, cout, 3)
    bn1 = _make_raw_bn(pg, cout)
    w2, cb2 = _make_raw_conv(pg, cout, cout, 3)
    bn2 = _make_raw_bn(pg, cout)
    raw = dict(w1=w1, cb1=cb1, bn1=bn1, w2=w2, cb2=cb2, bn2=bn2)
    kp = {}
    kp['w1'], kp['b1'] = _prep_conv(w1, cb1, bn1)
    kp['w2'], kp['b2'] = _prep_conv(w2, cb2, bn2)
    if use_1x1:
        w3, cb3 = _make_raw_conv(pg, cin, cout, 1)
        raw['w3'], raw['cb3'] = w3, cb3
        kp['w3'], kp['b3'] = _prep_conv(w3, cb3, None)
    return kp, raw


# ---------------------------------------------------------------------------
# Pure-JAX reference (f32, eval-mode BN) for correctness checking
# ---------------------------------------------------------------------------
def _ref_conv(x_nhwc, w_oihw, b, stride, pad):
    w_hwio = jnp.transpose(w_oihw, (2, 3, 1, 0))
    out = jax.lax.conv_general_dilated(
        x_nhwc, w_hwio, window_strides=(stride, stride),
        padding=[(pad, pad), (pad, pad)],
        dimension_numbers=("NHWC", "HWIO", "NHWC"),
        precision=jax.lax.Precision.HIGHEST)
    return out + b[None, None, None, :]


def residual_reference(x_nchw, raw, stride, use_1x1):
    x = jnp.transpose(x_nchw, (0, 2, 3, 1)).astype(jnp.float32)

    def bn(z, p):
        return (z - p['mean']) / jnp.sqrt(p['var'] + EPS) * p['gamma'] + p['beta']

    y = jax.nn.relu(bn(_ref_conv(x, raw['w1'], raw['cb1'], stride, 1), raw['bn1']))
    y = bn(_ref_conv(y, raw['w2'], raw['cb2'], 1, 1), raw['bn2'])
    sc = _ref_conv(x, raw['w3'], raw['cb3'], stride, 0) if use_1x1 else x
    y = jax.nn.relu(y + sc)
    return jnp.transpose(y, (0, 3, 1, 2))


# ---------------------------------------------------------------------------
if __name__ == "__main__":
    key = jax.random.PRNGKey(0)
    cin, cout = 64, 128
    x = jax.random.normal(key, (2, cin, 16, 16), dtype=jnp.float32)  # NCHW

    pg = ParamGen(0)
    # Block A: channel-changing, strided, with 1x1 shortcut conv.
    kpA, rawA = make_residual_params(pg, cin, cout, use_1x1=True)
    # Block B: identity shortcut, stride 1.
    kpB, rawB = make_residual_params(pg, cout, cout, use_1x1=False)

    yA = residual_forward(x, kpA, stride=2, use_1x1=True)
    yB = residual_forward(yA, kpB, stride=1, use_1x1=False)
    yB = jax.block_until_ready(yB)

    assert yA.shape == (2, cout, 8, 8), yA.shape
    assert yB.shape == (2, cout, 8, 8), yB.shape
    assert bool(jnp.all(jnp.isfinite(yB)))
    assert bool(jnp.all(yB >= 0.0))  # final ReLU

    # Compare against a pure-JAX f32 reference (bf16 MXU inputs => loose tol).
    refA = residual_reference(x, rawA, stride=2, use_1x1=True)
    refB = residual_reference(refA, rawB, stride=1, use_1x1=False)
    errA = float(jnp.max(jnp.abs(yA - refA)) / (jnp.max(jnp.abs(refA)) + 1e-6))
    errB = float(jnp.max(jnp.abs(yB - refB)) / (jnp.max(jnp.abs(refB)) + 1e-6))
    assert errA < 5e-2, errA
    assert errB < 5e-2, errB

    print("KERNEL_OK")
</pallas_src>

<mosaic_0001>
module attributes {stable_mosaic.version = 11 : i64} {
  func.func @_fused_matmul_kernel(%arg0: i32, %arg1: i32, %arg2: i32, %arg3: memref<128x640xbf16, #tpu.memory_space<vmem>>, %arg4: memref<640x128xbf16, #tpu.memory_space<vmem>>, %arg5: memref<1x128xf32, #tpu.memory_space<vmem>>, %arg6: memref<128x128xf32, #tpu.memory_space<vmem>>) attributes {dimension_semantics = [#tpu.dimension_semantics<parallel>, #tpu.dimension_semantics<parallel>, #tpu.dimension_semantics<arbitrary>], iteration_bounds = array<i64: 1, 1, 1>, scalar_prefetch = 0 : i64, scratch_operands = 0 : i64, tpu.core_type = #tpu.core_type<tc>, window_params = [{transform_indices = @transform_0, window_bounds = array<i64: 128, 640>}, {transform_indices = @transform_1, window_bounds = array<i64: 640, 128>}, {transform_indices = @transform_2, window_bounds = array<i64: 1, 128>}, {transform_indices = @transform_3, window_bounds = array<i64: 128, 128>}]} {
    %c0_i32 = arith.constant 0 : i32
    %0 = arith.cmpi eq, %arg2, %c0_i32 : i32
    %1 = arith.extui %0 : i1 to i32
    %c0_i32_0 = arith.constant 0 : i32
    %2 = arith.cmpi ne, %1, %c0_i32_0 : i32
    scf.if %2 {
      %cst_10 = arith.constant 0.000000e+00 : f32
      %12 = vector.broadcast %cst_10 : f32 to vector<128x128xf32>
      %c0_11 = arith.constant 0 : index
      %c0_12 = arith.constant 0 : index
      %13 = vector.load %arg6[%c0_11, %c0_12] : memref<128x128xf32, #tpu.memory_space<vmem>>, vector<128x128xf32>
      tpu.vector_store %arg6[%c0_11, %c0_12], %12 {strides = array<i32>} : memref<128x128xf32, #tpu.memory_space<vmem>>, vector<128x128xf32>,
    } else {
    }
    %c0 = arith.constant 0 : index
    %c0_1 = arith.constant 0 : index
    %3 = vector.load %arg6[%c0, %c0_1] : memref<128x128xf32, #tpu.memory_space<vmem>>, vector<128x128xf32>
    %c0_2 = arith.constant 0 : index
    %c0_3 = arith.constant 0 : index
    %4 = vector.load %arg3[%c0_2, %c0_3] : memref<128x640xbf16, #tpu.memory_space<vmem>>, vector<128x640xbf16>
    %c0_4 = arith.constant 0 : index
    %c0_5 = arith.constant 0 : index
    %5 = vector.load %arg4[%c0_4, %c0_5] : memref<640x128xbf16, #tpu.memory_space<vmem>>, vector<640x128xbf16>
    %cst = arith.constant dense<0.000000e+00> : vector<128x128xf32>
    %6 = tpu.matmul %4, %5, %cst {dimension_numbers = #tpu.dot_dimension_numbers<[1], [0], [0], [1], [0, 0, 1, 1], [], []>} : vector<128x640xbf16>, vector<640x128xbf16>, vector<128x128xf32> -> vector<128x128xf32>
    %7 = arith.addf %3, %6 : vector<128x128xf32>
    %c0_6 = arith.constant 0 : index
    %c0_7 = arith.constant 0 : index
    %8 = vector.load %arg6[%c0_6, %c0_7] : memref<128x128xf32, #tpu.memory_space<vmem>>, vector<128x128xf32>
    tpu.vector_store %arg6[%c0_6, %c0_7], %7 {strides = array<i32>} : memref<128x128xf32, #tpu.memory_space<vmem>>, vector<128x128xf32>,
    %c0_i32_8 = arith.constant 0 : i32
    %9 = arith.cmpi eq, %arg2, %c0_i32_8 : i32
    %10 = arith.extui %9 : i1 to i32
    %c0_i32_9 = arith.constant 0 : i32
    %11 = arith.cmpi ne, %10, %c0_i32_9 : i32
    scf.if %11 {
      %c0_10 = arith.constant 0 : index
      %c0_11 = arith.constant 0 : index
      %12 = vector.load %arg6[%c0_10, %c0_11] : memref<128x128xf32, #tpu.memory_space<vmem>>, vector<128x128xf32>
      %c0_12 = arith.constant 0 : index
      %c0_13 = arith.constant 0 : index
      %13 = vector.load %arg5[%c0_12, %c0_13] : memref<1x128xf32, #tpu.memory_space<vmem>>, vector<1x128xf32>
      %14 = vector.broadcast %13 : vector<1x128xf32> to vector<128x128xf32>
      %15 = arith.addf %12, %14 : vector<128x128xf32>
      %cst_14 = arith.constant 0.000000e+00 : f32
      %16 = vector.broadcast %cst_14 : f32 to vector<128x128xf32>
      %17 = arith.maximumf %15, %16 : vector<128x128xf32>
      %c0_15 = arith.constant 0 : index
      %c0_16 = arith.constant 0 : index
      %18 = vector.load %arg6[%c0_15, %c0_16] : memref<128x128xf32, #tpu.memory_space<vmem>>, vector<128x128xf32>
      tpu.vector_store %arg6[%c0_15, %c0_16], %17 {strides = array<i32>} : memref<128x128xf32, #tpu.memory_space<vmem>>, vector<128x128xf32>,
    } else {
    }
    return
  }
  func.func @transform_0(%arg0: i32, %arg1: i32, %arg2: i32) -> (i32, i32) {
    %c0_i32 = arith.constant 0 : i32
    return %arg0, %arg2 : i32, i32
  }
  func.func @transform_1(%arg0: i32, %arg1: i32, %arg2: i32) -> (i32, i32) {
    %c0_i32 = arith.constant 0 : i32
    return %arg2, %arg1 : i32, i32
  }
  func.func @transform_2(%arg0: i32, %arg1: i32, %arg2: i32) -> (i32, i32) {
    %c0_i32 = arith.constant 0 : i32
    %c0_i32_0 = arith.constant 0 : i32
    return %c0_i32, %arg1 : i32, i32
  }
  func.func @transform_3(%arg0: i32, %arg1: i32, %arg2: i32) -> (i32, i32) {
    %c0_i32 = arith.constant 0 : i32
    return %arg0, %arg1 : i32, i32
  }
}

module attributes {stable_mosaic.version = 11 : i64} {
  func.func @_fused_matmul_kernel(%arg0: i32, %arg1: i32, %arg2: i32, %arg3: memref<128x128xbf16, #tpu.memory_space<vmem>>, %arg4: memref<128x128xbf16, #tpu.memory_space<vmem>>, %arg5: memref<1x128xf32, #tpu.memory_space<vmem>>, %arg6: memref<128x128xf32, #tpu.memory_space<vmem>>) attributes {dimension_semantics = [#tpu.dimension_semantics<parallel>, #tpu.dimension_semantics<parallel>, #tpu.dimension_semantics<arbitrary>], iteration_bounds = array<i64: 1, 1, 1>, scalar_prefetch = 0 : i64, scratch_operands = 0 : i64, tpu.core_type = #tpu.core_type<tc>, window_params = [{transform_indices = @transform_0, window_bounds = array<i64: 128, 128>}, {transform_indices = @transform_1, window_bounds = array<i64: 128, 128>}, {transform_indices = @transform_2, window_bounds = array<i64: 1, 128>}, {transform_indices = @transform_3, window_bounds = array<i64: 128, 128>}]} {
    %c0_i32 = arith.constant 0 : i32
    %0 = arith.cmpi eq, %arg2, %c0_i32 : i32
    %1 = arith.extui %0 : i1 to i32
    %c0_i32_0 = arith.constant 0 : i32
    %2 = arith.cmpi ne, %1, %c0_i32_0 : i32
    scf.if %2 {
      %cst_10 = arith.constant 0.000000e+00 : f32
      %12 = vector.broadcast %cst_10 : f32 to vector<128x128xf32>
      %c0_11 = arith.constant 0 : index
      %c0_12 = arith.constant 0 : index
      %13 = vector.load %arg6[%c0_11, %c0_12] : memref<128x128xf32, #tpu.memory_space<vmem>>, vector<128x128xf32>
      tpu.vector_store %arg6[%c0_11, %c0_12], %12 {strides = array<i32>} : memref<128x128xf32, #tpu.memory_space<vmem>>, vector<128x128xf32>,
    } else {
    }
    %c0 = arith.constant 0 : index
    %c0_1 = arith.constant 0 : index
    %3 = vector.load %arg6[%c0, %c0_1] : memref<128x128xf32, #tpu.memory_space<vmem>>, vector<128x128xf32>
    %c0_2 = arith.constant 0 : index
    %c0_3 = arith.constant 0 : index
    %4 = vector.load %arg3[%c0_2, %c0_3] : memref<128x128xbf16, #tpu.memory_space<vmem>>, vector<128x128xbf16>
    %c0_4 = arith.constant 0 : index
    %c0_5 = arith.constant 0 : index
    %5 = vector.load %arg4[%c0_4, %c0_5] : memref<128x128xbf16, #tpu.memory_space<vmem>>, vector<128x128xbf16>
    %cst = arith.constant dense<0.000000e+00> : vector<128x128xf32>
    %6 = tpu.matmul %4, %5, %cst {dimension_numbers = #tpu.dot_dimension_numbers<[1], [0], [0], [1], [0, 0, 1, 1], [], []>} : vector<128x128xbf16>, vector<128x128xbf16>, vector<128x128xf32> -> vector<128x128xf32>
    %7 = arith.addf %3, %6 : vector<128x128xf32>
    %c0_6 = arith.constant 0 : index
    %c0_7 = arith.constant 0 : index
    %8 = vector.load %arg6[%c0_6, %c0_7] : memref<128x128xf32, #tpu.memory_space<vmem>>, vector<128x128xf32>
    tpu.vector_store %arg6[%c0_6, %c0_7], %7 {strides = array<i32>} : memref<128x128xf32, #tpu.memory_space<vmem>>, vector<128x128xf32>,
    %c0_i32_8 = arith.constant 0 : i32
    %9 = arith.cmpi eq, %arg2, %c0_i32_8 : i32
    %10 = arith.extui %9 : i1 to i32
    %c0_i32_9 = arith.constant 0 : i32
    %11 = arith.cmpi ne, %10, %c0_i32_9 : i32
    scf.if %11 {
      %c0_10 = arith.constant 0 : index
      %c0_11 = arith.constant 0 : index
      %12 = vector.load %arg6[%c0_10, %c0_11] : memref<128x128xf32, #tpu.memory_space<vmem>>, vector<128x128xf32>
      %c0_12 = arith.constant 0 : index
      %c0_13 = arith.constant 0 : index
      %13 = vector.load %arg5[%c0_12, %c0_13] : memref<1x128xf32, #tpu.memory_space<vmem>>, vector<1x128xf32>
      %14 = vector.broadcast %13 : vector<1x128xf32> to vector<128x128xf32>
      %15 = arith.addf %12, %14 : vector<128x128xf32>
      %c0_14 = arith.constant 0 : index
      %c0_15 = arith.constant 0 : index
      %16 = vector.load %arg6[%c0_14, %c0_15] : memref<128x128xf32, #tpu.memory_space<vmem>>, vector<128x128xf32>
      tpu.vector_store %arg6[%c0_14, %c0_15], %15 {strides = array<i32>} : memref<128x128xf32, #tpu.memory_space<vmem>>, vector<128x128xf32>,
    } else {
    }
    return
  }
  func.func @transform_0(%arg0: i32, %arg1: i32, %arg2: i32) -> (i32, i32) {
    %c0_i32 = arith.constant 0 : i32
    return %arg0, %arg2 : i32, i32
  }
  func.func @transform_1(%arg0: i32, %arg1: i32, %arg2: i32) -> (i32, i32) {
    %c0_i32 = arith.constant 0 : i32
    return %arg2, %arg1 : i32, i32
  }
  func.func @transform_2(%arg0: i32, %arg1: i32, %arg2: i32) -> (i32, i32) {
    %c0_i32 = arith.constant 0 : i32
    %c0_i32_0 = arith.constant 0 : i32
    return %c0_i32, %arg1 : i32, i32
  }
  func.func @transform_3(%arg0: i32, %arg1: i32, %arg2: i32) -> (i32, i32) {
    %c0_i32 = arith.constant 0 : i32
    return %arg0, %arg1 : i32, i32
  }
}

module attributes {stable_mosaic.version = 11 : i64} {
  func.func @_fused_matmul_kernel(%arg0: i32, %arg1: i32, %arg2: i32, %arg3: memref<128x128xbf16, #tpu.memory_space<vmem>>, %arg4: memref<128x128xbf16, #tpu.memory_space<vmem>>, %arg5: memref<1x128xf32, #tpu.memory_space<vmem>>, %arg6: memref<128x128xf32, #tpu.memory_space<vmem>>, %arg7: memref<128x128xf32, #tpu.memory_space<vmem>>) attributes {dimension_semantics = [#tpu.dimension_semantics<parallel>, #tpu.dimension_semantics<parallel>, #tpu.dimension_semantics<arbitrary>], iteration_bounds = array<i64: 1, 1, 9>, scalar_prefetch = 0 : i64, scratch_operands = 0 : i64, tpu.core_type = #tpu.core_type<tc>, window_params = [{transform_indices = @transform_0, window_bounds = array<i64: 128, 128>}, {transform_indices = @transform_1, window_bounds = array<i64: 128, 128>}, {transform_indices = @transform_2, window_bounds = array<i64: 1, 128>}, {transform_indices = @transform_3, window_bounds = array<i64: 128, 128>}, {transform_indices = @transform_4, window_bounds = array<i64: 128, 128>}]} {
    %c0_i32 = arith.constant 0 : i32
    %0 = arith.cmpi eq, %arg2, %c0_i32 : i32
    %1 = arith.extui %0 : i1 to i32
    %c0_i32_0 = arith.constant 0 : i32
    %2 = arith.cmpi ne, %1, %c0_i32_0 : i32
    scf.if %2 {
      %cst_9 = arith.constant 0.000000e+00 : f32
      %12 = vector.broadcast %cst_9 : f32 to vector<128x128xf32>
      %c0_10 = arith.constant 0 : index
      %c0_11 = arith.constant 0 : index
      %13 = vector.load %arg7[%c0_10, %c0_11] : memref<128x128xf32, #tpu.memory_space<vmem>>, vector<128x128xf32>
      tpu.vector_store %arg7[%c0_10, %c0_11], %12 {strides = array<i32>} : memref<128x128xf32, #tpu.memory_space<vmem>>, vector<128x128xf32>,
    } else {
    }
    %c0 = arith.constant 0 : index
    %c0_1 = arith.constant 0 : index
    %3 = vector.load %arg7[%c0, %c0_1] : memref<128x128xf32, #tpu.memory_space<vmem>>, vector<128x128xf32>
    %c0_2 = arith.constant 0 : index
    %c0_3 = arith.constant 0 : index
    %4 = vector.load %arg3[%c0_2, %c0_3] : memref<128x128xbf16, #tpu.memory_space<vmem>>, vector<128x128xbf16>
    %c0_4 = arith.constant 0 : index
    %c0_5 = arith.constant 0 : index
    %5 = vector.load %arg4[%c0_4, %c0_5] : memref<128x128xbf16, #tpu.memory_space<vmem>>, vector<128x128xbf16>
    %cst = arith.constant dense<0.000000e+00> : vector<128x128xf32>
    %6 = tpu.matmul %4, %5, %cst {dimension_numbers = #tpu.dot_dimension_numbers<[1], [0], [0], [1], [0, 0, 1, 1], [], []>} : vector<128x128xbf16>, vector<128x128xbf16>, vector<128x128xf32> -> vector<128x128xf32>
    %7 = arith.addf %3, %6 : vector<128x128xf32>
    %c0_6 = arith.constant 0 : index
    %c0_7 = arith.constant 0 : index
    %8 = vector.load %arg7[%c0_6, %c0_7] : memref<128x128xf32, #tpu.memory_space<vmem>>, vector<128x128xf32>
    tpu.vector_store %arg7[%c0_6, %c0_7], %7 {strides = array<i32>} : memref<128x128xf32, #tpu.memory_space<vmem>>, vector<128x128xf32>,
    %c8_i32 = arith.constant 8 : i32
    %9 = arith.cmpi eq, %arg2, %c8_i32 : i32
    %10 = arith.extui %9 : i1 to i32
    %c0_i32_8 = arith.constant 0 : i32
    %11 = arith.cmpi ne, %10, %c0_i32_8 : i32
    scf.if %11 {
      %c0_9 = arith.constant 0 : index
      %c0_10 = arith.constant 0 : index
      %12 = vector.load %arg7[%c0_9, %c0_10] : memref<128x128xf32, #tpu.memory_space<vmem>>, vector<128x128xf32>
      %c0_11 = arith.constant 0 : index
      %c0_12 = arith.constant 0 : index
      %13 = vector.load %arg5[%c0_11, %c0_12] : memref<1x128xf32, #tpu.memory_space<vmem>>, vector<1x128xf32>
      %14 = vector.broadcast %13 : vector<1x128xf32> to vector<128x128xf32>
      %15 = arith.addf %12, %14 : vector<128x128xf32>
      %c0_13 = arith.constant 0 : index
      %c0_14 = arith.constant 0 : index
      %16 = vector.load %arg6[%c0_13, %c0_14] : memref<128x128xf32, #tpu.memory_space<vmem>>, vector<128x128xf32>
      %17 = arith.addf %15, %16 : vector<128x128xf32>
      %cst_15 = arith.constant 0.000000e+00 : f32
      %18 = vector.broadcast %cst_15 : f32 to vector<128x128xf32>
      %19 = arith.maximumf %17, %18 : vector<128x128xf32>
      %c0_16 = arith.constant 0 : index
      %c0_17 = arith.constant 0 : index
      %20 = vector.load %arg7[%c0_16, %c0_17] : memref<128x128xf32, #tpu.memory_space<vmem>>, vector<128x128xf32>
      tpu.vector_store %arg7[%c0_16, %c0_17], %19 {strides = array<i32>} : memref<128x128xf32, #tpu.memory_space<vmem>>, vector<128x128xf32>,
    } else {
    }
    return
  }
  func.func @transform_0(%arg0: i32, %arg1: i32, %arg2: i32) -> (i32, i32) {
    %c0_i32 = arith.constant 0 : i32
    return %arg0, %arg2 : i32, i32
  }
  func.func @transform_1(%arg0: i32, %arg1: i32, %arg2: i32) -> (i32, i32) {
    %c0_i32 = arith.constant 0 : i32
    return %arg2, %arg1 : i32, i32
  }
  func.func @transform_2(%arg0: i32, %arg1: i32, %arg2: i32) -> (i32, i32) {
    %c0_i32 = arith.constant 0 : i32
    %c0_i32_0 = arith.constant 0 : i32
    return %c0_i32, %arg1 : i32, i32
  }
  func.func @transform_3(%arg0: i32, %arg1: i32, %arg2: i32) -> (i32, i32) {
    %c0_i32 = arith.constant 0 : i32
    return %arg0, %arg1 : i32, i32
  }
  func.func @transform_4(%arg0: i32, %arg1: i32, %arg2: i32) -> (i32, i32) {
    %c0_i32 = arith.constant 0 : i32
    return %arg0, %arg1 : i32, i32
  }
}

</mosaic_0001>

<bundles_post_ra>
// kernel: residual_forward.3
= control target key start
LH: loop header
LB: loop body
LE: loop exit
PB: predicated region body
PF: predicated region fallthrough
CT: control target
= control target key end

     0   :  { %s1757_s1 = inlined_call_operand.vmem [shape: bf16[640,128], index: 1, kind: input, shape index: {}]   ;;  %s1758_s0 = inlined_call_operand.vmem [shape: bf16[128,640], index: 0, kind: input, shape index: {}]   ;;  %s1759_s2 = inlined_call_operand.vmem [shape: f32[1,128], index: 2, kind: input, shape index: {}]   ;;  %s1760_s3 = inlined_call_operand.vmem [shape: f32[128,128], index: 3, kind: output, shape index: {}]  }
   0x1   :  { %v1302_v0 = vld [vmem:[%s1757_s1 + $0x40] sm:$0xff]   ;;  %v1306_v4 = vld [vmem:[%s1757_s1 + $0x48] sm:$0xff]   ;;  %v1310_v8 = vld [vmem:[%s1757_s1 + $0x50] sm:$0xff]  }
   0x2   :  { %v1303_v1 = vld [vmem:[%s1757_s1 + $0xc0] sm:$0xff]   ;;  %1109 = vmatprep.subr.bf16.mxu0 %v1302_v0  ;;  %v1307_v5 = vld [vmem:[%s1757_s1 + $0xc8] sm:$0xff]   ;;  %v1311_v9 = vld [vmem:[%s1757_s1 + $0xd0] sm:$0xff]  }
   0x3   :  { %v1304_v2 = vld [vmem:[%s1757_s1] sm:$0xff]   ;;  %1173 = vmatprep.subr.bf16.mxu1 %v1303_v1  ;;  %v1308_v6 = vld [vmem:[%s1757_s1 + $0x8] sm:$0xff]   ;;  %v1312_v10 = vld [vmem:[%s1757_s1 + $0x10] sm:$0xff]  }
   0x4   :  { %v1305_v3 = vld [vmem:[%s1757_s1 + $0x80] sm:$0xff]   ;;  %1110 = vmatpush3.bf16.msra.mxu0 %v1304_v2  ;;  %v1309_v7 = vld [vmem:[%s1757_s1 + $0x88] sm:$0xff]   ;;  %v1313_v11 = vld [vmem:[%s1757_s1 + $0x90] sm:$0xff]  }
   0x5   :  { %1174 = vmatpush3.bf16.msra.mxu1 %v1305_v3  ;;  %1111 = vmatprep.subr.bf16.mxu0 %v1306_v4  ;;  %v1314_v12 = vld [vmem:[%s1757_s1 + $0x58] sm:$0xff]   ;;  %v1318_v16 = vld [vmem:[%s1757_s1 + $0x60] sm:$0xff]   ;;  %v1322_v20 = vld [vmem:[%s1757_s1 + $0x68] sm:$0xff]  }
   0x6   :  { %1175 = vmatprep.subr.bf16.mxu1 %v1307_v5  ;;  %v1315_v13 = vld [vmem:[%s1757_s1 + $0xd8] sm:$0xff]   ;;  %v1319_v17 = vld [vmem:[%s1757_s1 + $0xe0] sm:$0xff]   ;;  %v1323_v21 = vld [vmem:[%s1757_s1 + $0xe8] sm:$0xff]  }
   0x7   :  { %v1316_v14 = vld [vmem:[%s1757_s1 + $0x18] sm:$0xff]   ;;  %v1320_v18 = vld [vmem:[%s1757_s1 + $0x20] sm:$0xff]   ;;  %v1324_v22 = vld [vmem:[%s1757_s1 + $0x28] sm:$0xff]  }
   0x8   :  { %1112 = vmatpush3.bf16.msra.mxu0 %v1308_v6  ;;  %v1317_v15 = vld [vmem:[%s1757_s1 + $0x98] sm:$0xff]   ;;  %v1321_v19 = vld [vmem:[%s1757_s1 + $0xa0] sm:$0xff]   ;;  %v1325_v23 = vld [vmem:[%s1757_s1 + $0xa8] sm:$0xff]  }
   0x9   :  { %1176 = vmatpush3.bf16.msra.mxu1 %v1309_v7  ;;  %1113 = vmatprep.subr.bf16.mxu0 %v1310_v8  ;;  %v1326_v24 = vld [vmem:[%s1757_s1 + $0x70] sm:$0xff]   ;;  %v1330_v28 = vld [vmem:[%s1757_s1 + $0x78] sm:$0xff]   ;;  %v1339_v35 = vld [vmem:[%s1758_s0 + $0xc] ss:$20 sps:$4 sm:$0xff]  }
   0xa   :  { %1177 = vmatprep.subr.bf16.mxu1 %v1311_v9  ;;  %v1327_v25 = vld [vmem:[%s1757_s1 + $0xf0] sm:$0xff]   ;;  %v1331_v29 = vld [vmem:[%s1757_s1 + $0xf8] sm:$0xff]   ;;  %v1340_v36 = vld [vmem:[%s1757_s1 + $0x100] sm:$0xff]   ;;  %756 = vmatprep.mubr.bf16.mxu1 %v1339_v35 }
   0xb   :  { %v1328_v26 = vld [vmem:[%s1757_s1 + $0x30] sm:$0xff]   ;;  %v1332_v30 = vld [vmem:[%s1757_s1 + $0x38] sm:$0xff]   ;;  %v1341_v37 = vld [vmem:[%s1758_s0 + $0x2c] ss:$20 sps:$4 sm:$0xff]  }
   0xc   :  { %1114 = vmatpush3.bf16.msra.mxu0 %v1312_v10  ;;  %v1329_v27 = vld [vmem:[%s1757_s1 + $0xb0] sm:$0xff]   ;;  %v1333_v31 = vld [vmem:[%s1757_s1 + $0xb8] sm:$0xff]   ;;  %v1347_v39 = vld [vmem:[%s1757_s1 + $0x108] sm:$0xff]  }
   0xd   :  { %1178 = vmatpush3.bf16.msra.mxu1 %v1313_v11  ;;  %1115 = vmatprep.subr.bf16.mxu0 %v1314_v12  ;;  %v1334_v32 = vld [vmem:[%s1758_s0] ss:$20 sps:$4 sm:$0xff]   ;;  %v1336_v33 = vld [vmem:[%s1758_s0 + $0x4] ss:$20 sps:$4 sm:$0xff]   ;;  %v1337_v34 = vld [vmem:[%s1758_s0 + $0x8] ss:$20 sps:$4 sm:$0xff]  }
   0xe   :  { %1179 = vmatprep.subr.bf16.mxu1 %v1315_v13  ;;  %659 = vmatprep.mubr.bf16.mxu0 %v1336_v33  ;;  %v1343_v38 = vld [vmem:[%s1758_s0 + $0x34] ss:$20 sps:$4 sm:$0xff]   ;;  %v1346_v41 = vld [vmem:[%s1758_s0 + $0x30] ss:$20 sps:$4 sm:$0xff]   ;;  %v1361_v45 = vld [vmem:[%s1757_s1 + $0x118] sm:$0xff]  }
   0xf   :  { %v1345_v40 = vld [vmem:[%s1758_s0 + $0x28] ss:$20 sps:$4 sm:$0xff]   ;;  %v1354_v44 = vld [vmem:[%s1757_s1 + $0x110] sm:$0xff]   ;;  %v1353_v47 = vld [vmem:[%s1758_s0 + $0x58] ss:$20 sps:$4 sm:$0xff]  }
  0x10   :  { %1116 = vmatpush3.bf16.msra.mxu0 %v1316_v14  ;;  %v1348_v42 = vld [vmem:[%s1758_s0 + $0x54] ss:$20 sps:$4 sm:$0xff]   ;;  %v1350_v43 = vld [vmem:[%s1758_s0 + $0x5c] ss:$20 sps:$4 sm:$0xff]   ;;  %v1357_v49 = vld [vmem:[%s1758_s0 + $0x84] ss:$20 sps:$4 sm:$0xff]  }
  0x11   :  { %1180 = vmatpush3.bf16.msra.mxu1 %v1317_v15  ;;  %1117 = vmatprep.subr.bf16.mxu0 %v1318_v16  ;;  %v1352_v46 = vld [vmem:[%s1758_s0 + $0x50] ss:$20 sps:$4 sm:$0xff]   ;;  %v1375_v51 = vld [vmem:[%s1757_s1 + $0x128] sm:$0xff]   ;;  %v1360_v53 = vld [vmem:[%s1758_s0 + $0x80] ss:$20 sps:$4 sm:$0xff]  }
  0x12   :  { %1181 = vmatprep.subr.bf16.mxu1 %v1319_v17  ;;  %v1355_v48 = vld [vmem:[%s1758_s0 + $0x7c] ss:$20 sps:$4 sm:$0xff]   ;;  %v1368_v50 = vld [vmem:[%s1757_s1 + $0x120] sm:$0xff]   ;;  %v1359_v52 = vld [vmem:[%s1758_s0 + $0x78] ss:$20 sps:$4 sm:$0xff]  }
  0x13   :  { %v1362_v54 = vld [vmem:[%s1758_s0 + $0xa4] ss:$20 sps:$4 sm:$0xff]   ;;  %v1382_v55 = vld [vmem:[%s1757_s1 + $0x130] sm:$0xff]   ;;  %v1364_v56 = vld [vmem:[%s1758_s0 + $0xac] ss:$20 sps:$4 sm:$0xff]  }
  0x14   :  { %1118 = vmatpush3.bf16.msra.mxu0 %v1320_v18  ;;  %v1389_v57 = vld [vmem:[%s1757_s1 + $0x138] sm:$0xff]   ;;  %v1366_v58 = vld [vmem:[%s1758_s0 + $0xa0] ss:$20 sps:$4 sm:$0xff]   ;;  %v1374_v63 = vld [vmem:[%s1758_s0 + $0xd0] ss:$20 sps:$4 sm:$0xff]  }
  0x15   :  { %1182 = vmatpush3.bf16.msra.mxu1 %v1321_v19  ;;  %1119 = vmatprep.subr.bf16.mxu0 %v1322_v20  ;;  %v1367_v59 = vld [vmem:[%s1758_s0 + $0xa8] ss:$20 sps:$4 sm:$0xff]   ;;  %v1369_v60 = vld [vmem:[%s1758_s0 + $0xcc] ss:$20 sps:$4 sm:$0xff]   ;;  %v1380_v2 = vld [vmem:[%s1758_s0 + $0xf0] ss:$20 sps:$4 sm:$0xff]  }
  0x16   :  { %1183 = vmatprep.subr.bf16.mxu1 %v1323_v21  ;;  %v1371_v61 = vld [vmem:[%s1758_s0 + $0xd4] ss:$20 sps:$4 sm:$0xff]   ;;  %v1378_v1 = vld [vmem:[%s1758_s0 + $0xfc] ss:$20 sps:$4 sm:$0xff]   ;;  %v1381_v3 = vld [vmem:[%s1758_s0 + $0xf8] ss:$20 sps:$4 sm:$0xff]  }
  0x17   :  { %v1373_v62 = vld [vmem:[%s1758_s0 + $0xc8] ss:$20 sps:$4 sm:$0xff]   ;;  %v1385_v5 = vld [vmem:[%s1758_s0 + $0x124] ss:$20 sps:$4 sm:$0xff]   ;;  %v1388_v7 = vld [vmem:[%s1758_s0 + $0x120] ss:$20 sps:$4 sm:$0xff]  }
  0x18   :  { %1120 = vmatpush3.bf16.msra.mxu0 %v1324_v22  ;;  %v1376_v0 = vld [vmem:[%s1758_s0 + $0xf4] ss:$20 sps:$4 sm:$0xff]   ;;  %v1383_v4 = vld [vmem:[%s1758_s0 + $0x11c] ss:$20 sps:$4 sm:$0xff]   ;;  %v1387_v6 = vld [vmem:[%s1758_s0 + $0x118] ss:$20 sps:$4 sm:$0xff]  }
  0x19   :  { %1184 = vmatpush3.bf16.msra.mxu1 %v1325_v23  ;;  %1121 = vmatprep.subr.bf16.mxu0 %v1326_v24  ;;  %v1390_v8 = vld [vmem:[%s1758_s0 + $0x10] ss:$20 sps:$4 sm:$0xff]   ;;  %v1392_v10 = vld [vmem:[%s1758_s0 + $0x38] ss:$20 sps:$4 sm:$0xff]   ;;  %v1394_v12 = vld [vmem:[%s1758_s0 + $0x60] ss:$20 sps:$4 sm:$0xff]  }
  0x1a   :  { %1185 = vmatprep.subr.bf16.mxu1 %v1327_v25  ;;  %v1391_v9 = vld [vmem:[%s1758_s0 + $0xb0] ss:$20 sps:$4 sm:$0xff]   ;;  %v1393_v11 = vld [vmem:[%s1758_s0 + $0xd8] ss:$20 sps:$4 sm:$0xff]   ;;  %v1395_v13 = vld [vmem:[%s1758_s0 + $0x100] ss:$20 sps:$4 sm:$0xff]  }
  0x1b   :  { %v1396_v14 = vld [vmem:[%s1758_s0 + $0x88] ss:$20 sps:$4 sm:$0xff]  }
  0x1c   :  { %1122 = vmatpush3.bf16.msra.mxu0 %v1328_v26  ;;  %v1397_v15 = vld [vmem:[%s1758_s0 + $0x128] ss:$20 sps:$4 sm:$0xff]  }
  0x1d   :  { %1186 = vmatpush3.bf16.msra.mxu1 %v1329_v27  ;;  %1123 = vmatprep.subr.bf16.mxu0 %v1330_v28 }
  0x1e   :  { %1187 = vmatprep.subr.bf16.mxu1 %v1331_v29 }
  0x20   :  { %1124 = vmatpush3.bf16.msra.mxu0 %v1332_v30 }
  0x21   :  { %1188 = vmatpush3.bf16.msra.mxu1 %v1333_v31  ;;  %1253 = vmatprep.subr.bf16.mxu0 %v1340_v36 }
  0x22   :  { %1285 = vmatprep.subr.bf16.mxu1 %v1340_v36 }
  0x23   :  { %660 = vmatmul.mubr.bf16.vlgmr.msra.gmra.mrb[0].mxu0 %v1334_v32 }
  0x24   :  { %757 = vmatmul.mubr.bf16.vlgmr.msra.gmra.mrb[0].mxu1 %v1337_v34  ;;  %1254 = vmatpush3.bf16.msra.mxu0 %v1340_v36 }
  0x25   :  { %1293 = vmatpush3.bf16.msra.mxu1 %v1340_v36  ;;  %667 = vmatprep.mubr.bf16.mxu0 %v1341_v37 }
  0x26   :  { %764 = vmatprep.mubr.bf16.mxu1 %v1343_v38  ;;  %1255 = vmatprep.subr.bf16.mxu0 %v1347_v39 }
  0x27   :  { %1286 = vmatprep.subr.bf16.mxu1 %v1347_v39 }
  0x28   :  { %1256 = vmatpush3.bf16.msra.mxu0 %v1347_v39 }
  0x29   :  { %1294 = vmatpush3.bf16.msra.mxu1 %v1347_v39  ;;  %1257 = vmatprep.subr.bf16.mxu0 %v1354_v44 }
  0x2a   :  { %1287 = vmatprep.subr.bf16.mxu1 %v1354_v44 }
  0x2b   :  { %668 = vmatmul.mubr.bf16.gmra.mrb[4].mxu0 %v1345_v40 }
  0x2c   :  { %765 = vmatmul.mubr.bf16.gmra.mrb[4].mxu1 %v1346_v41  ;;  %675 = vmatprep.mubr.bf16.mxu0 %v1348_v42 }
  0x2d   :  { %772 = vmatprep.mubr.bf16.mxu1 %v1350_v43  ;;  %1258 = vmatpush3.bf16.msra.mxu0 %v1354_v44 }
  0x2e   :  { %1295 = vmatpush3.bf16.msra.mxu1 %v1354_v44  ;;  %1259 = vmatprep.subr.bf16.mxu0 %v1361_v45 }
  0x2f   :  { %1288 = vmatprep.subr.bf16.mxu1 %v1361_v45 }
  0x31   :  { %1260 = vmatpush3.bf16.msra.mxu0 %v1361_v45 }
  0x32   :  { %1296 = vmatpush3.bf16.msra.mxu1 %v1361_v45  ;;  %1261 = vmatprep.subr.bf16.mxu0 %v1368_v50 }
  0x33   :  { %676 = vmatmul.mubr.bf16.gmra.mrb[8].mxu0 %v1352_v46  ;;  %1289 = vmatprep.subr.bf16.mxu1 %v1368_v50 }
  0x34   :  { %773 = vmatmul.mubr.bf16.gmra.mrb[8].mxu1 %v1353_v47  ;;  %683 = vmatprep.mubr.bf16.mxu0 %v1355_v48 }
  0x35   :  { %780 = vmatprep.mubr.bf16.mxu1 %v1357_v49  ;;  %1262 = vmatpush3.bf16.msra.mxu0 %v1368_v50 }
  0x36   :  { %1297 = vmatpush3.bf16.msra.mxu1 %v1368_v50  ;;  %1263 = vmatprep.subr.bf16.mxu0 %v1375_v51 }
  0x37   :  { %1290 = vmatprep.subr.bf16.mxu1 %v1375_v51 }
  0x39   :  { %1264 = vmatpush3.bf16.msra.mxu0 %v1375_v51 }
  0x3a   :  { %1298 = vmatpush3.bf16.msra.mxu1 %v1375_v51  ;;  %1265 = vmatprep.subr.bf16.mxu0 %v1382_v55 }
  0x3b   :  { %684 = vmatmul.mubr.bf16.gmra.mrb[12].mxu0 %v1359_v52  ;;  %1291 = vmatprep.subr.bf16.mxu1 %v1382_v55 }
  0x3c   :  { %781 = vmatmul.mubr.bf16.gmra.mrb[12].mxu1 %v1360_v53  ;;  %691 = vmatprep.mubr.bf16.mxu0 %v1362_v54 }
  0x3d   :  { %788 = vmatprep.mubr.bf16.mxu1 %v1364_v56  ;;  %1266 = vmatpush3.bf16.msra.mxu0 %v1382_v55 }
  0x3e   :  { %1299 = vmatpush3.bf16.msra.mxu1 %v1382_v55  ;;  %1267 = vmatprep.subr.bf16.mxu0 %v1389_v57 }
  0x3f   :  { %1292 = vmatprep.subr.bf16.mxu1 %v1389_v57 }
  0x41   :  { %1268 = vmatpush3.bf16.msra.mxu0 %v1389_v57 }
  0x42   :  { %1300 = vmatpush3.bf16.msra.mxu1 %v1389_v57 }
  0x43   :  { %692 = vmatmul.mubr.bf16.gmra.mrb[16].mxu0 %v1366_v58 }
  0x44   :  { %789 = vmatmul.mubr.bf16.gmra.mrb[16].mxu1 %v1367_v59  ;;  %699 = vmatprep.mubr.bf16.mxu0 %v1369_v60 }
  0x45   :  { %796 = vmatprep.mubr.bf16.mxu1 %v1371_v61 }
  0x4b   :  { %700 = vmatmul.mubr.bf16.gmra.mrb[20].mxu0 %v1373_v62 }
  0x4c   :  { %797 = vmatmul.mubr.bf16.gmra.mrb[20].mxu1 %v1374_v63  ;;  %707 = vmatprep.mubr.bf16.mxu0 %v1376_v0 }
  0x4d   :  { %804 = vmatprep.mubr.bf16.mxu1 %v1378_v1 }
  0x53   :  { %708 = vmatmul.mubr.bf16.gmra.mrb[24].mxu0 %v1380_v2 }
  0x54   :  { %805 = vmatmul.mubr.bf16.gmra.mrb[24].mxu1 %v1381_v3  ;;  %715 = vmatprep.mubr.bf16.mxu0 %v1383_v4 }
  0x55   :  { %812 = vmatprep.mubr.bf16.mxu1 %v1385_v5 }
  0x5b   :  { %716 = vmatmul.mubr.bf16.gmra.mrb[28].mxu0 %v1387_v6 }
  0x5c   :  { %813 = vmatmul.mubr.bf16.gmra.mrb[28].mxu1 %v1388_v7  ;;  %1269 = vmatprep.mubr.bf16.mxu0 %v1390_v8 }
  0x5d   :  { %1277 = vmatprep.mubr.bf16.mxu1 %v1391_v9 }
  0x63   :  { %1270 = vmatmul.mubr.bf16.vlgmr.msra.gmra.mrb[32].mxu0 %v1392_v10 }
  0x64   :  { %1278 = vmatmul.mubr.bf16.vlgmr.msra.gmra.mrb[32].mxu1 %v1393_v11  ;;  %1273 = vmatprep.mubr.bf16.mxu0 %v1394_v12 }
  0x65   :  { %1281 = vmatprep.mubr.bf16.mxu1 %v1395_v13 }
  0x6b   :  { %1274 = vmatmul.mubr.bf16.gmra.mrb[36].mxu0 %v1396_v14 }
  0x6c   :  { %1282 = vmatmul.mubr.bf16.gmra.mrb[36].mxu1 %v1397_v15 }
  0xf6   :  { %v1125_v16 = vpop.f32.mrb[0].mxu0 }
  0xf7   :  { %v1189_v17 = vpop.f32.mrb[0].mxu1  ;;  %v1126_v18 = vpop.f32.mrb[1].mxu0 }
  0xf8   :  { %v1127_v19 = vadd.f32 %v1126_v18, %v1125_v16  ;;  %v1190_v20 = vpop.f32.mrb[1].mxu1  ;;  %v1128_v21 = vpop.f32.mrb[2].mxu0 }
  0xf9   :  { %v1191_v22 = vadd.f32 %v1190_v20, %v1189_v17  ;;  %v1192_v23 = vpop.f32.mrb[2].mxu1  ;;  %v1129_v24 = vpop.f32.mrb[3].mxu0 }
  0xfa   :  { %v1130_v25 = vadd.f32 %v1129_v24, %v1128_v21  ;;  %v1193_v26 = vpop.f32.mrb[3].mxu1 }
  0xfb   :  { %v1194_v27 = vadd.f32 %v1193_v26, %v1192_v23  ;;  %v1658_v28 = vadd.f32 %v1191_v22, %v1127_v19 }
  0xfd   :  { %v1660_v29 = vadd.f32 %v1194_v27, %v1130_v25 }
  0xfe   :  { %v1131_v30 = vpop.f32.mrb[4].mxu0 }
  0xff   :  { %v1195_v31 = vpop.f32.mrb[4].mxu1  ;;  %v1132_v32 = vpop.f32.mrb[5].mxu0 }
 0x100   :  { %v1133_v33 = vadd.f32 %v1132_v32, %v1131_v30  ;;  %v1196_v34 = vpop.f32.mrb[5].mxu1  ;;  %v1134_v35 = vpop.f32.mrb[6].mxu0 }
 0x101   :  { %v1197_v36 = vadd.f32 %v1196_v34, %v1195_v31  ;;  %v1198_v37 = vpop.f32.mrb[6].mxu1  ;;  %v1135_v38 = vpop.f32.mrb[7].mxu0 }
 0x102   :  { %v1136_v39 = vadd.f32 %v1135_v38, %v1134_v35  ;;  %v1199_v40 = vpop.f32.mrb[7].mxu1 }
 0x103   :  { %v1200_v41 = vadd.f32 %v1199_v40, %v1198_v37  ;;  %v1662_v42 = vadd.f32 %v1197_v36, %v1133_v33 }
 0x105   :  { %v1664_v43 = vadd.f32 %v1200_v41, %v1136_v39 }
 0x106   :  { %v1137_v44 = vpop.f32.mrb[8].mxu0 }
 0x107   :  { %v1201_v45 = vpop.f32.mrb[8].mxu1  ;;  %v1138_v46 = vpop.f32.mrb[9].mxu0 }
 0x108   :  { %v1139_v47 = vadd.f32 %v1138_v46, %v1137_v44  ;;  %v1202_v48 = vpop.f32.mrb[9].mxu1  ;;  %v1140_v49 = vpop.f32.mrb[10].mxu0 }
 0x109   :  { %v1203_v50 = vadd.f32 %v1202_v48, %v1201_v45  ;;  %v1204_v51 = vpop.f32.mrb[10].mxu1  ;;  %v1141_v52 = vpop.f32.mrb[11].mxu0 }
 0x10a   :  { %v1142_v53 = vadd.f32 %v1141_v52, %v1140_v49  ;;  %v1205_v54 = vpop.f32.mrb[11].mxu1 }
 0x10b   :  { %v1206_v55 = vadd.f32 %v1205_v54, %v1204_v51  ;;  %v1666_v56 = vadd.f32 %v1203_v50, %v1139_v47 }
 0x10d   :  { %v1668_v57 = vadd.f32 %v1206_v55, %v1142_v53 }
 0x10e   :  { %v1143_v58 = vpop.f32.mrb[12].mxu0 }
 0x10f   :  { %v1207_v59 = vpop.f32.mrb[12].mxu1  ;;  %v1144_v60 = vpop.f32.mrb[13].mxu0 }
 0x110   :  { %v1145_v61 = vadd.f32 %v1144_v60, %v1143_v58  ;;  %v1208_v62 = vpop.f32.mrb[13].mxu1  ;;  %v1146_v63 = vpop.f32.mrb[14].mxu0 }
 0x111   :  { %v1209_v0 = vadd.f32 %v1208_v62, %v1207_v59  ;;  %v1210_v1 = vpop.f32.mrb[14].mxu1  ;;  %v1147_v2 = vpop.f32.mrb[15].mxu0 }
 0x112   :  { %v1148_v3 = vadd.f32 %v1147_v2, %v1146_v63  ;;  %v1211_v4 = vpop.f32.mrb[15].mxu1 }
 0x113   :  { %v1212_v5 = vadd.f32 %v1211_v4, %v1210_v1  ;;  %v1670_v6 = vadd.f32 %v1209_v0, %v1145_v61 }
 0x115   :  { %v1672_v7 = vadd.f32 %v1212_v5, %v1148_v3 }
 0x116   :  { %v1149_v8 = vpop.f32.mrb[16].mxu0 }
 0x117   :  { %v1213_v9 = vpop.f32.mrb[16].mxu1  ;;  %v1150_v10 = vpop.f32.mrb[17].mxu0 }
 0x118   :  { %v1151_v11 = vadd.f32 %v1150_v10, %v1149_v8  ;;  %v1214_v12 = vpop.f32.mrb[17].mxu1  ;;  %v1152_v13 = vpop.f32.mrb[18].mxu0 }
 0x119   :  { %v1215_v14 = vadd.f32 %v1214_v12, %v1213_v9  ;;  %v1216_v15 = vpop.f32.mrb[18].mxu1  ;;  %v1153_v16 = vpop.f32.mrb[19].mxu0  ;;  %v1682_v12 = vld [vmem:[%s1759_s2] ss:$0 sm:$0xff] }
 0x11a   :  { %v1154_v17 = vadd.f32 %v1153_v16, %v1152_v13  ;;  %v1217_v18 = vpop.f32.mrb[19].mxu1 }
 0x11b   :  { %v1218_v19 = vadd.f32 %v1217_v18, %v1216_v15  ;;  %v791_v20 = vadd.f32 %v1215_v14, %v1151_v11 }
 0x11d   :  { %v794_v21 = vadd.f32 %v1218_v19, %v1154_v17 }
 0x11e   :  { %v1155_v22 = vpop.f32.mrb[20].mxu0 }
 0x11f   :  { %v1219_v23 = vpop.f32.mrb[20].mxu1  ;;  %v1156_v24 = vpop.f32.mrb[21].mxu0 }
 0x120   :  { %v1157_v25 = vadd.f32 %v1156_v24, %v1155_v22  ;;  %v1220_v26 = vpop.f32.mrb[21].mxu1  ;;  %v1158_v27 = vpop.f32.mrb[22].mxu0 }
 0x121   :  { %v1221_v30 = vadd.f32 %v1220_v26, %v1219_v23  ;;  %v1222_v31 = vpop.f32.mrb[22].mxu1  ;;  %v1159_v32 = vpop.f32.mrb[23].mxu0 }
 0x122   :  { %v1160_v33 = vadd.f32 %v1159_v32, %v1158_v27  ;;  %v1223_v34 = vpop.f32.mrb[23].mxu1 }
 0x123   :  { %v1224_v35 = vadd.f32 %v1223_v34, %v1222_v31  ;;  %v799_v36 = vadd.f32 %v1221_v30, %v1157_v25 }
 0x125   :  { %v802_v37 = vadd.f32 %v1224_v35, %v1160_v33 }
 0x126   :  { %v1161_v38 = vpop.f32.mrb[24].mxu0 }
 0x127   :  { %v1225_v39 = vpop.f32.mrb[24].mxu1  ;;  %v1162_v40 = vpop.f32.mrb[25].mxu0 }
 0x128   :  { %v1163_v41 = vadd.f32 %v1162_v40, %v1161_v38  ;;  %v1226_v44 = vpop.f32.mrb[25].mxu1  ;;  %v1164_v45 = vpop.f32.mrb[26].mxu0 }
 0x129   :  { %v1227_v46 = vadd.f32 %v1226_v44, %v1225_v39  ;;  %v1228_v47 = vpop.f32.mrb[26].mxu1  ;;  %v1165_v48 = vpop.f32.mrb[27].mxu0 }
 0x12a   :  { %v1166_v49 = vadd.f32 %v1165_v48, %v1164_v45  ;;  %v1229_v50 = vpop.f32.mrb[27].mxu1 }
 0x12b   :  { %v1230_v51 = vadd.f32 %v1229_v50, %v1228_v47  ;;  %v1674_v52 = vadd.f32 %v1227_v46, %v1163_v41 }
 0x12d   :  { %v1676_v53 = vadd.f32 %v1230_v51, %v1166_v49 }
 0x12e   :  { %v1167_v54 = vpop.f32.mrb[28].mxu0 }
 0x12f   :  { %v1231_v55 = vpop.f32.mrb[28].mxu1  ;;  %v1168_v58 = vpop.f32.mrb[29].mxu0 }
 0x130   :  { %v1169_v59 = vadd.f32 %v1168_v58, %v1167_v54  ;;  %v1232_v60 = vpop.f32.mrb[29].mxu1  ;;  %v1170_v61 = vpop.f32.mrb[30].mxu0 }
 0x131   :  { %v1233_v62 = vadd.f32 %v1232_v60, %v1231_v55  ;;  %v1234_v63 = vpop.f32.mrb[30].mxu1  ;;  %v1171_v0 = vpop.f32.mrb[31].mxu0 }
 0x132   :  { %v1172_v1 = vadd.f32 %v1171_v0, %v1170_v61  ;;  %v1235_v2 = vpop.f32.mrb[31].mxu1 }
 0x133   :  { %v1236_v3 = vadd.f32 %v1235_v2, %v1234_v63  ;;  %v815_v4 = vadd.f32 %v1233_v62, %v1169_v59 }
 0x135   :  { %v818_v5 = vadd.f32 %v1236_v3, %v1172_v1 }
 0x136   :  { %v1271_v8 = vpop.f32.mrb[32].mxu0 }
 0x137   :  { %v864_v9 = vadd.f32 %v1271_v8, %v1662_v42  ;;  %v1279_v10 = vpop.f32.mrb[32].mxu1  ;;  %v855_v11 = vpop.f32.mrb[33].mxu0 }
 0x138   :  { %v896_v13 = vadd.f32 %v1279_v10, %v799_v36  ;;  %v856_v14 = vadd.f32 %v855_v11, %v1658_v28  ;;  %v887_v15 = vpop.f32.mrb[33].mxu1  ;;  %v1272_v16 = vpop.f32.mrb[34].mxu0 }
 0x139   :  { %v888_v17 = vadd.f32 %v887_v15, %v791_v20  ;;  %v867_v18 = vadd.f32 %v1272_v16, %v1664_v43  ;;  %v1280_v19 = vpop.f32.mrb[34].mxu1  ;;  %v858_v22 = vpop.f32.mrb[35].mxu0  ;;  %v978_v25 = vadd.f32 %v1682_v12, %v864_v9 }
 0x13a   :  { %v899_v23 = vadd.f32 %v1280_v19, %v802_v37  ;;  %v859_v42 = vadd.f32 %v858_v22, %v1660_v29  ;;  %v890_v24 = vpop.f32.mrb[35].mxu1  ;;  %v986_v27 = vadd.f32 %v1682_v12, %v896_v13  ;;  %v976_v30 = vadd.f32 %v1682_v12, %v856_v14 }
 0x13b   :  { %v891_v26 = vadd.f32 %v890_v24, %v794_v21  ;;  %v994_v31 = vmax.f32 %v978_v25, 0.0  ;;  %v984_v28 = vadd.f32 %v1682_v12, %v888_v17  ;;  %v979_v20 = vadd.f32 %v1682_v12, %v867_v18 }
 0x13c   :  { %v1002_v32 = vmax.f32 %v986_v27, 0.0  ;;  %v992_v43 = vmax.f32 %v976_v30, 0.0  ;;  %v987_v33 = vadd.f32 %v1682_v12, %v899_v23  ;;  %v977_v34 = vadd.f32 %v1682_v12, %v859_v42 }
 0x13d   :  { %1010 = vst [vmem:[%s1760_s3 + $0x10] sm:$0xff] %v994_v31  ;;  %v1000_v21 = vmax.f32 %v984_v28, 0.0  ;;  %v995_v35 = vmax.f32 %v979_v20, 0.0  ;;  %v985_v36 = vadd.f32 %v1682_v12, %v891_v26 }
 0x13e   :  { %v1275_v29 = vpop.f32.mrb[36].mxu0  ;;  %1018 = vst [vmem:[%s1760_s3 + $0x50] sm:$0xff] %v1002_v32  ;;  %1008 = vst [vmem:[%s1760_s3] sm:$0xff] %v992_v43  ;;  %v1003_v40 = vmax.f32 %v987_v33, 0.0  ;;  %v993_v41 = vmax.f32 %v977_v34, 0.0 }
 0x13f   :  { %v880_v37 = vadd.f32 %v1275_v29, %v1670_v6  ;;  %v1283_v38 = vpop.f32.mrb[36].mxu1  ;;  %v871_v39 = vpop.f32.mrb[37].mxu0  ;;  %1016 = vst [vmem:[%s1760_s3 + $0x40] sm:$0xff] %v1000_v21  ;;  %1011 = vst [vmem:[%s1760_s3 + $0x18] sm:$0xff] %v995_v35  ;;  %v1001_v6 = vmax.f32 %v985_v36, 0.0 }
 0x140   :  { %v912_v44 = vadd.f32 %v1283_v38, %v815_v4  ;;  %v872_v45 = vadd.f32 %v871_v39, %v1666_v56  ;;  %v903_v46 = vpop.f32.mrb[37].mxu1  ;;  %v1276_v47 = vpop.f32.mrb[38].mxu0  ;;  %1019 = vst [vmem:[%s1760_s3 + $0x58] sm:$0xff] %v1003_v40  ;;  %1009 = vst [vmem:[%s1760_s3 + $0x8] sm:$0xff] %v993_v41 }
 0x141   :  { %v904_v48 = vadd.f32 %v903_v46, %v1674_v52  ;;  %v883_v49 = vadd.f32 %v1276_v47, %v1672_v7  ;;  %v1284_v50 = vpop.f32.mrb[38].mxu1  ;;  %v874_v51 = vpop.f32.mrb[39].mxu0  ;;  %1017 = vst [vmem:[%s1760_s3 + $0x48] sm:$0xff] %v1001_v6  ;;  %v982_v7 = vadd.f32 %v1682_v12, %v880_v37 }
 0x142   :  { %v915_v56 = vadd.f32 %v1284_v50, %v818_v5  ;;  %v875_v54 = vadd.f32 %v874_v51, %v1668_v57  ;;  %v906_v55 = vpop.f32.mrb[39].mxu1  ;;  %v990_v58 = vadd.f32 %v1682_v12, %v912_v44  ;;  %v980_v59 = vadd.f32 %v1682_v12, %v872_v45 }
 0x143   :  { %v907_v52 = vadd.f32 %v906_v55, %v1676_v53  ;;  %v998_v60 = vmax.f32 %v982_v7, 0.0  ;;  %v988_v61 = vadd.f32 %v1682_v12, %v904_v48  ;;  %v983_v62 = vadd.f32 %v1682_v12, %v883_v49 }
 0x144   :  { %v1006_v63 = vmax.f32 %v990_v58, 0.0  ;;  %v996_v57 = vmax.f32 %v980_v59, 0.0  ;;  %v991_v0 = vadd.f32 %v1682_v12, %v915_v56  ;;  %v981_v1 = vadd.f32 %v1682_v12, %v875_v54 }
 0x145   :  { %1014 = vst [vmem:[%s1760_s3 + $0x30] sm:$0xff] %v998_v60  ;;  %v1004_v53 = vmax.f32 %v988_v61, 0.0  ;;  %v999_v2 = vmax.f32 %v983_v62, 0.0  ;;  %v989_v3 = vadd.f32 %v1682_v12, %v907_v52 }
 0x146   :  { %1022 = vst [vmem:[%s1760_s3 + $0x70] sm:$0xff] %v1006_v63  ;;  %1012 = vst [vmem:[%s1760_s3 + $0x20] sm:$0xff] %v996_v57  ;;  %v1007_v4 = vmax.f32 %v991_v0, 0.0  ;;  %v997_v5 = vmax.f32 %v981_v1, 0.0 }
 0x147   :  { %1020 = vst [vmem:[%s1760_s3 + $0x60] sm:$0xff] %v1004_v53  ;;  %1015 = vst [vmem:[%s1760_s3 + $0x38] sm:$0xff] %v999_v2  ;;  %v1005_v8 = vmax.f32 %v989_v3, 0.0 }
 0x148   :  { %1023 = vst [vmem:[%s1760_s3 + $0x78] sm:$0xff] %v1007_v4  ;;  %1013 = vst [vmem:[%s1760_s3 + $0x28] sm:$0xff] %v997_v5 }
 0x149   :  { %1021 = vst [vmem:[%s1760_s3 + $0x68] sm:$0xff] %v1005_v8 }

// kernel: residual_forward.4
= control target key start
LH: loop header
LB: loop body
LE: loop exit
PB: predicated region body
PF: predicated region fallthrough
CT: control target
= control target key end

     0   :  { %s587_s1 = inlined_call_operand.vmem [shape: bf16[128,128], index: 1, kind: input, shape index: {}]   ;;  %s588_s0 = inlined_call_operand.vmem [shape: bf16[128,128], index: 0, kind: input, shape index: {}]   ;;  %s589_s2 = inlined_call_operand.vmem [shape: f32[1,128], index: 2, kind: input, shape index: {}]   ;;  %s590_s3 = inlined_call_operand.vmem [shape: f32[128,128], index: 3, kind: output, shape index: {}]  }
   0x1   :  { %v452_v0 = vld [vmem:[%s587_s1] sm:$0xff]   ;;  %v453_v1 = vld [vmem:[%s587_s1 + $0x8] sm:$0xff]   ;;  %v454_v2 = vld [vmem:[%s587_s1 + $0x10] sm:$0xff]  }
   0x2   :  { %403 = vmatprep.subr.bf16.mxu0 %v452_v0  ;;  %435 = vmatprep.subr.bf16.mxu1 %v452_v0  ;;  %v455_v3 = vld [vmem:[%s587_s1 + $0x18] sm:$0xff]   ;;  %v460_v4 = vld [vmem:[%s588_s0] sm:$0xff]   ;;  %v457_v7 = vld [vmem:[%s587_s1 + $0x28] sm:$0xff]  }
   0x3   :  { %404 = vmatpush3.bf16.msra.mxu0 %v452_v0  ;;  %443 = vmatpush3.bf16.msra.mxu1 %v452_v0  ;;  %v461_v5 = vld [vmem:[%s588_s0 + $0x20] sm:$0xff]   ;;  %v458_v8 = vld [vmem:[%s587_s1 + $0x30] sm:$0xff]   ;;  %v459_v9 = vld [vmem:[%s587_s1 + $0x38] sm:$0xff]  }
   0x4   :  { %405 = vmatprep.subr.bf16.mxu0 %v453_v1  ;;  %436 = vmatprep.subr.bf16.mxu1 %v453_v1  ;;  %v456_v6 = vld [vmem:[%s587_s1 + $0x20] sm:$0xff]   ;;  %v462_v10 = vld [vmem:[%s588_s0 + $0x8] sm:$0xff]   ;;  %v464_v12 = vld [vmem:[%s588_s0 + $0x10] sm:$0xff]  }
   0x5   :  { %419 = vmatprep.mubr.bf16.mxu0 %v460_v4  ;;  %427 = vmatprep.mubr.bf16.mxu1 %v461_v5  ;;  %v463_v11 = vld [vmem:[%s588_s0 + $0x28] sm:$0xff]   ;;  %v465_v13 = vld [vmem:[%s588_s0 + $0x30] sm:$0xff]   ;;  %v466_v14 = vld [vmem:[%s588_s0 + $0x18] sm:$0xff]  }
   0x6   :  { %v467_v15 = vld [vmem:[%s588_s0 + $0x38] sm:$0xff]   ;;  %v386_v17 = vld [vmem:[%s589_s2] ss:$0 sm:$0xff] }
   0x7   :  { %406 = vmatpush3.bf16.msra.mxu0 %v453_v1  ;;  %444 = vmatpush3.bf16.msra.mxu1 %v453_v1 }
   0x8   :  { %407 = vmatprep.subr.bf16.mxu0 %v454_v2  ;;  %437 = vmatprep.subr.bf16.mxu1 %v454_v2 }
   0xb   :  { %408 = vmatpush3.bf16.msra.mxu0 %v454_v2  ;;  %445 = vmatpush3.bf16.msra.mxu1 %v454_v2 }
   0xc   :  { %409 = vmatprep.subr.bf16.mxu0 %v455_v3  ;;  %438 = vmatprep.subr.bf16.mxu1 %v455_v3 }
   0xf   :  { %410 = vmatpush3.bf16.msra.mxu0 %v455_v3  ;;  %446 = vmatpush3.bf16.msra.mxu1 %v455_v3 }
  0x10   :  { %411 = vmatprep.subr.bf16.mxu0 %v456_v6  ;;  %439 = vmatprep.subr.bf16.mxu1 %v456_v6 }
  0x13   :  { %412 = vmatpush3.bf16.msra.mxu0 %v456_v6  ;;  %447 = vmatpush3.bf16.msra.mxu1 %v456_v6 }
  0x14   :  { %413 = vmatprep.subr.bf16.mxu0 %v457_v7  ;;  %440 = vmatprep.subr.bf16.mxu1 %v457_v7 }
  0x17   :  { %414 = vmatpush3.bf16.msra.mxu0 %v457_v7  ;;  %448 = vmatpush3.bf16.msra.mxu1 %v457_v7 }
  0x18   :  { %415 = vmatprep.subr.bf16.mxu0 %v458_v8  ;;  %441 = vmatprep.subr.bf16.mxu1 %v458_v8 }
  0x1b   :  { %416 = vmatpush3.bf16.msra.mxu0 %v458_v8  ;;  %449 = vmatpush3.bf16.msra.mxu1 %v458_v8 }
  0x1c   :  { %417 = vmatprep.subr.bf16.mxu0 %v459_v9  ;;  %442 = vmatprep.subr.bf16.mxu1 %v459_v9 }
  0x1f   :  { %418 = vmatpush3.bf16.msra.mxu0 %v459_v9  ;;  %450 = vmatpush3.bf16.msra.mxu1 %v459_v9 }
  0x22   :  { %420 = vmatmul.mubr.bf16.vlgmr.msra.gmra.mrb[0].mxu0 %v462_v10  ;;  %428 = vmatmul.mubr.bf16.vlgmr.msra.gmra.mrb[0].mxu1 %v463_v11 }
  0x23   :  { %423 = vmatprep.mubr.bf16.mxu0 %v464_v12  ;;  %431 = vmatprep.mubr.bf16.mxu1 %v465_v13 }
  0x2a   :  { %424 = vmatmul.mubr.bf16.gmra.mrb[4].mxu0 %v466_v14  ;;  %432 = vmatmul.mubr.bf16.gmra.mrb[4].mxu1 %v467_v15 }
  0xf5   :  { %v421_v16 = vpop.f32.mrb[0].mxu0  ;;  %v429_v18 = vpop.f32.mrb[0].mxu1 }
  0xf6   :  { %v213_v19 = vpop.f32.mrb[1].mxu0  ;;  %v245_v20 = vpop.f32.mrb[1].mxu1  ;;  %v336_v23 = vadd.f32 %v421_v16, %v386_v17  ;;  %v344_v24 = vadd.f32 %v429_v18, %v386_v17 }
  0xf7   :  { %v422_v21 = vpop.f32.mrb[2].mxu0  ;;  %v430_v22 = vpop.f32.mrb[2].mxu1  ;;  %v334_v27 = vadd.f32 %v386_v17, %v213_v19  ;;  %v342_v28 = vadd.f32 %v386_v17, %v245_v20 }
  0xf8   :  { %v216_v25 = vpop.f32.mrb[3].mxu0  ;;  %v248_v26 = vpop.f32.mrb[3].mxu1  ;;  %352 = vst [vmem:[%s590_s3 + $0x10] sm:$0xff] %v336_v23  ;;  %360 = vst [vmem:[%s590_s3 + $0x50] sm:$0xff] %v344_v24  ;;  %v337_v29 = vadd.f32 %v422_v21, %v386_v17  ;;  %v345_v30 = vadd.f32 %v430_v22, %v386_v17 }
  0xf9   :  { %350 = vst [vmem:[%s590_s3] sm:$0xff] %v334_v27  ;;  %358 = vst [vmem:[%s590_s3 + $0x40] sm:$0xff] %v342_v28  ;;  %v335_v31 = vadd.f32 %v386_v17, %v216_v25  ;;  %v343_v32 = vadd.f32 %v386_v17, %v248_v26 }
  0xfa   :  { %353 = vst [vmem:[%s590_s3 + $0x18] sm:$0xff] %v337_v29  ;;  %361 = vst [vmem:[%s590_s3 + $0x58] sm:$0xff] %v345_v30 }
  0xfb   :  { %351 = vst [vmem:[%s590_s3 + $0x8] sm:$0xff] %v335_v31  ;;  %359 = vst [vmem:[%s590_s3 + $0x48] sm:$0xff] %v343_v32 }
  0xfd   :  { %v425_v33 = vpop.f32.mrb[4].mxu0  ;;  %v433_v34 = vpop.f32.mrb[4].mxu1 }
  0xfe   :  { %v229_v35 = vpop.f32.mrb[5].mxu0  ;;  %v261_v36 = vpop.f32.mrb[5].mxu1  ;;  %v340_v39 = vadd.f32 %v425_v33, %v386_v17  ;;  %v348_v40 = vadd.f32 %v433_v34, %v386_v17 }
  0xff   :  { %v426_v37 = vpop.f32.mrb[6].mxu0  ;;  %v434_v38 = vpop.f32.mrb[6].mxu1  ;;  %v338_v43 = vadd.f32 %v386_v17, %v229_v35  ;;  %v346_v44 = vadd.f32 %v386_v17, %v261_v36 }
 0x100   :  { %v232_v41 = vpop.f32.mrb[7].mxu0  ;;  %v264_v42 = vpop.f32.mrb[7].mxu1  ;;  %356 = vst [vmem:[%s590_s3 + $0x30] sm:$0xff] %v340_v39  ;;  %364 = vst [vmem:[%s590_s3 + $0x70] sm:$0xff] %v348_v40  ;;  %v341_v45 = vadd.f32 %v426_v37, %v386_v17  ;;  %v349_v46 = vadd.f32 %v434_v38, %v386_v17 }
 0x101   :  { %354 = vst [vmem:[%s590_s3 + $0x20] sm:$0xff] %v338_v43  ;;  %362 = vst [vmem:[%s590_s3 + $0x60] sm:$0xff] %v346_v44  ;;  %v339_v47 = vadd.f32 %v386_v17, %v232_v41  ;;  %v347_v48 = vadd.f32 %v386_v17, %v264_v42 }
 0x102   :  { %357 = vst [vmem:[%s590_s3 + $0x38] sm:$0xff] %v341_v45  ;;  %365 = vst [vmem:[%s590_s3 + $0x78] sm:$0xff] %v349_v46 }
 0x103   :  { %355 = vst [vmem:[%s590_s3 + $0x28] sm:$0xff] %v339_v47  ;;  %363 = vst [vmem:[%s590_s3 + $0x68] sm:$0xff] %v347_v48 }

// kernel: residual_forward.5
= control target key start
LH: loop header
LB: loop body
LE: loop exit
PB: predicated region body
PF: predicated region fallthrough
CT: control target
= control target key end

     0   :  { %9 = vsyncpa [#allocation4], 0  ;;  %s1183_s15 = smov 0   ;;  %s1185_s16 = smov 0   ;;  %s1386_s0 = inlined_call_operand.vmem [shape: bf16[128,1152], index: 0, kind: input, shape index: {}]   ;;  %s1387_s1 = inlined_call_operand.vmem [shape: bf16[1152,128], index: 1, kind: input, shape index: {}]   ;;  %s1388_s2 = inlined_call_operand.vmem [shape: f32[1,128], index: 2, kind: input, shape index: {}]   ;;  %s1389_s3 = inlined_call_operand.vmem [shape: f32[128,128], index: 3, kind: input, shape index: {}]   ;;  %s1390_s4 = inlined_call_operand.hbm [shape: f32[128,128], index: 4, kind: output, shape index: {}]  }
   0x1   :  { %s1187_s17 = smov 0   ;;  %s1189_s18 = smov 0  }
   0x2   :  { %s1191_s19 = smov 0  }
   0x3 LB: > { %s920_s20 = sadd.s32 4294967295, %s1152_s19   ;;  %s27_s21 = sadd.s32 1, %s1148_s18  ;;  %s1152_s19 = sphi %s1191_s19, %s15_s19   ;;  %s1148_s18 = sphi %s1189_s18, %s1395_s18   ;;  %s1144_s17 = sphi %s1187_s17, %s1394_s17   ;;  %s1140_s16 = sphi %s1185_s16, %s1393_s16   ;;  %s1136_s15 = sphi %s1183_s15, %s1392_s15  }
   0x4   : > { %p28_p0 = scmp.ge.s32.totalorder %s27_s21, 9  ;;  %p50_p1 = scmp.ne.s32.totalorder %s1140_s16, %s1136_s15 }
   0x5   : > { %p51_p2 = scmp.eq.s32.totalorder %s1152_s19, 0  ;;  %s43_s23 = sadd.s32 1, %s1140_s16 }
   0x6   : > { %s1397_s21 = smov (%p28_p0, %s27_s21), 0  ;;  %p924_p5 = scmp.ge.s32.totalorder %s1152_s19, 9 }
   0x7   : > { %p52_p3 = por %p51_p2, %p50_p1  ;;  %s39_s22 = ssub.s32 %s1148_s18, %s1397_s21 }
   0x8   : > { %p41_p4 = scmp.eq.s32.totalorder %s39_s22, 0  ;;  %204 = sbr.rel (%p924_p5) target bundleno = 29 (0x1d), region = 24 }
   0xa   : > { %s1219_s24 = scalar_select %p41_p4, %s1140_s16, %s43_s23  }
   0xf   : > { %207 = sbr.rel (!%p52_p3) target bundleno = 29 (0x1d), region = 28  ;;  %s209_s25 = sand.u32 (%p52_p3), 1, %s1140_s16  }
  0x10   : > { %s926_s26 = sshll.u32 (%p52_p3), %s1148_s18, 2  ;;  %s925_s27 = sshll.u32 (%p52_p3), %s209_s25, 6 }
  0x11   : > { %s1227_s30 = scalar_lea.vmem (%p52_p3), %s1386_s0, %s926_s26  ;;  %s211_s5 = scalar_lea.vmem (%p52_p3), [#allocation2], %s925_s27 }
  0x12   : > { %v232_v0 = vld [vmem:[%s1227_s30] sm:$0xf] (%p52_p3)  ;;  %v234_v1 = vld [vmem:[%s1227_s30 + $0x24] sm:$0xf] (%p52_p3)  ;;  %v236_v2 = vld [vmem:[%s1227_s30 + $0x48] sm:$0xf] (%p52_p3) }
  0x13   : > { %233 = vst [vmem:[%s211_s5] sm:$0xf] (%p52_p3), %v232_v0  ;;  %235 = vst [vmem:[%s211_s5 + $0x4] sm:$0xf] (%p52_p3), %v234_v1  ;;  %v238_v3 = vld [vmem:[%s1227_s30 + $0x6c] sm:$0xf] (%p52_p3) }
  0x14   : > { %v240_v4 = vld [vmem:[%s1227_s30 + $0x90] sm:$0xf] (%p52_p3)  ;;  %237 = vst [vmem:[%s211_s5 + $0x8] sm:$0xf] (%p52_p3), %v236_v2  ;;  %239 = vst [vmem:[%s211_s5 + $0xc] sm:$0xf] (%p52_p3), %v238_v3 }
  0x15   : > { %241 = vst [vmem:[%s211_s5 + $0x10] sm:$0xf] (%p52_p3), %v240_v4  ;;  %v242_v5 = vld [vmem:[%s1227_s30 + $0xb4] sm:$0xf] (%p52_p3)  ;;  %v244_v6 = vld [vmem:[%s1227_s30 + $0xd8] sm:$0xf] (%p52_p3) }
  0x16   : > { %v246_v7 = vld [vmem:[%s1227_s30 + $0xfc] sm:$0xf]  ;;  %243 = vst [vmem:[%s211_s5 + $0x14] sm:$0xf] %v242_v5  ;;  %245 = vst [vmem:[%s211_s5 + $0x18] sm:$0xf] %v244_v6 }
  0x17   : > { %247 = vst [vmem:[%s211_s5 + $0x1c] sm:$0xf] %v246_v7  ;;  %v248_v8 = vld [vmem:[%s1227_s30 + $0x120] sm:$0xf]  ;;  %v250_v9 = vld [vmem:[%s1227_s30 + $0x144] sm:$0xf] }
  0x18   : > { %v252_v10 = vld [vmem:[%s1227_s30 + $0x168] sm:$0xf]  ;;  %249 = vst [vmem:[%s211_s5 + $0x20] sm:$0xf] %v248_v8  ;;  %251 = vst [vmem:[%s211_s5 + $0x24] sm:$0xf] %v250_v9 }
  0x19   : > { %253 = vst [vmem:[%s211_s5 + $0x28] sm:$0xf] %v252_v10  ;;  %v254_v11 = vld [vmem:[%s1227_s30 + $0x18c] sm:$0xf]  ;;  %v256_v12 = vld [vmem:[%s1227_s30 + $0x1b0] sm:$0xf] }
  0x1a   : > { %v258_v13 = vld [vmem:[%s1227_s30 + $0x1d4] sm:$0xf]  ;;  %255 = vst [vmem:[%s211_s5 + $0x2c] sm:$0xf] %v254_v11  ;;  %257 = vst [vmem:[%s211_s5 + $0x30] sm:$0xf] %v256_v12 }
  0x1b   : > { %259 = vst [vmem:[%s211_s5 + $0x34] sm:$0xf] %v258_v13  ;;  %v260_v14 = vld [vmem:[%s1227_s30 + $0x1f8] sm:$0xf]  ;;  %v262_v15 = vld [vmem:[%s1227_s30 + $0x21c] sm:$0xf] }
  0x1c   : > { %261 = vst [vmem:[%s211_s5 + $0x38] sm:$0xf] %v260_v14  ;;  %263 = vst [vmem:[%s211_s5 + $0x3c] sm:$0xf] %v262_v15 }
  0x1d PF: > { %p927_p6 = scmp.ge.s32.totalorder %s1152_s19, 1  ;;  %p329_p7 = scmp.lt.s32.totalorder %s1152_s19, 10 }
  0x1f   : > { %p330_p8 = pnand %p927_p6, %p329_p7 }
  0x20   : > { %s336_s6 = sand.u32 (!%p330_p8), 1, %s1136_s15   ;;  %s929_s7 = sshll.u32 (!%p330_p8), %s1144_s17, 4 }
  0x21   : > { %333 = sbr.rel (%p330_p8) target bundleno = 350 (0x15e), region = 73  ;;  %s928_s8 = sshll.u32 (!%p330_p8), %s336_s6, 6 }
  0x22   : > { %p377_p9 = scmp.lt.s32.totalorder (!%p330_p8), %s929_s7, 143  ;;  %s1254_s13 = scalar_lea.vmem (!%p330_p8), [#allocation2], %s928_s8 }
  0x23   : > { %p931_p10 = scmp.ne.s32.totalorder (!%p330_p8), %s1144_s17, 0 }
  0x28   : > { %s1399_s7 = smov (!%p377_p9, %s929_s7), 143  ;;  %402 = sbr.rel (%p931_p10) target bundleno = 50 (0x32), region = 81 }
  0x29   : > { %s930_s9 = sshll.u32 %s1399_s7, 2  ;;  %v1154_v16 = vmov (!%p931_p10), 0.0  }
  0x2a   : > { %s1252_s12 = scalar_lea.vmem %s1387_s1, %s930_s9  ;;  %403 = vst [vmem:[#allocation3] sm:$0xff] (!%p931_p10), %v1154_v16  ;;  %404 = vst [vmem:[#allocation3 + $0x8] sm:$0xff] (!%p931_p10), %v1154_v16 }
  0x2b   : > { %405 = vst [vmem:[#allocation3 + $0x10] sm:$0xff] (!%p931_p10), %v1154_v16  ;;  %406 = vst [vmem:[#allocation3 + $0x18] sm:$0xff] (!%p931_p10), %v1154_v16 }
  0x2c   : > { %407 = vst [vmem:[#allocation3 + $0x20] sm:$0xff] (!%p931_p10), %v1154_v16  ;;  %408 = vst [vmem:[#allocation3 + $0x28] sm:$0xff] (!%p931_p10), %v1154_v16 }
  0x2d   : > { %409 = vst [vmem:[#allocation3 + $0x30] sm:$0xff] (!%p931_p10), %v1154_v16  ;;  %410 = vst [vmem:[#allocation3 + $0x38] sm:$0xff] (!%p931_p10), %v1154_v16 }
  0x2e   : > { %411 = vst [vmem:[#allocation3 + $0x40] sm:$0xff] (!%p931_p10), %v1154_v16  ;;  %412 = vst [vmem:[#allocation3 + $0x48] sm:$0xff] (!%p931_p10), %v1154_v16 }
  0x2f   : > { %413 = vst [vmem:[#allocation3 + $0x50] sm:$0xff] %v1154_v16  ;;  %414 = vst [vmem:[#allocation3 + $0x58] sm:$0xff] %v1154_v16 }
  0x30   : > { %415 = vst [vmem:[#allocation3 + $0x60] sm:$0xff] %v1154_v16  ;;  %416 = vst [vmem:[#allocation3 + $0x68] sm:$0xff] %v1154_v16 }
  0x31   : > { %417 = vst [vmem:[#allocation3 + $0x70] sm:$0xff] %v1154_v16  ;;  %418 = vst [vmem:[#allocation3 + $0x78] sm:$0xff] %v1154_v16 }
  0x32 PF: > { %v1068_v17 = vld [vmem:[%s1252_s12] sm:$0xff]   ;;  %v1069_v18 = vld [vmem:[%s1252_s12 + $0x8] sm:$0xff]   ;;  %v1070_v19 = vld [vmem:[%s1252_s12 + $0x10] sm:$0xff]   ;;  %p948_p11 = scmp.ne.s32.totalorder %s1144_s17, 8 }
  0x33   : > { %970 = vmatprep.subr.bf16.mxu0 %v1068_v17  ;;  %1002 = vmatprep.subr.bf16.mxu1 %v1068_v17  ;;  %v1071_v20 = vld [vmem:[%s1252_s12 + $0x18] sm:$0xff]   ;;  %v1076_v21 = vld [vmem:[%s1254_s13] sm:$0xff]   ;;  %v1073_v24 = vld [vmem:[%s1252_s12 + $0x28] sm:$0xff]  }
  0x34   : > { %971 = vmatpush3.bf16.msra.mxu0 %v1068_v17  ;;  %1010 = vmatpush3.bf16.msra.mxu1 %v1068_v17  ;;  %v1077_v22 = vld [vmem:[%s1254_s13 + $0x20] sm:$0xff]   ;;  %v1074_v25 = vld [vmem:[%s1252_s12 + $0x30] sm:$0xff]   ;;  %v1075_v26 = vld [vmem:[%s1252_s12 + $0x38] sm:$0xff]  }
  0x35   : > { %972 = vmatprep.subr.bf16.mxu0 %v1069_v18  ;;  %1003 = vmatprep.subr.bf16.mxu1 %v1069_v18  ;;  %v1072_v23 = vld [vmem:[%s1252_s12 + $0x20] sm:$0xff]   ;;  %v1078_v27 = vld [vmem:[%s1254_s13 + $0x8] sm:$0xff]   ;;  %v1080_v29 = vld [vmem:[%s1254_s13 + $0x10] sm:$0xff]  }
  0x36   : > { %986 = vmatprep.mubr.bf16.mxu0 %v1076_v21  ;;  %994 = vmatprep.mubr.bf16.mxu1 %v1077_v22  ;;  %v1079_v28 = vld [vmem:[%s1254_s13 + $0x28] sm:$0xff]   ;;  %v1081_v30 = vld [vmem:[%s1254_s13 + $0x30] sm:$0xff]   ;;  %v1082_v31 = vld [vmem:[%s1254_s13 + $0x18] sm:$0xff]  }
  0x37   : > { %v1083_v32 = vld [vmem:[%s1254_s13 + $0x38] sm:$0xff]   ;;  %v421_v33 = vld [vmem:[#allocation3 + $0x10] sm:$0xff]  ;;  %v419_v35 = vld [vmem:[#allocation3] sm:$0xff] }
  0x38   : > { %973 = vmatpush3.bf16.msra.mxu0 %v1069_v18  ;;  %1011 = vmatpush3.bf16.msra.mxu1 %v1069_v18  ;;  %v429_v34 = vld [vmem:[#allocation3 + $0x50] sm:$0xff]  ;;  %v427_v36 = vld [vmem:[#allocation3 + $0x40] sm:$0xff]  ;;  %v422_v39 = vld [vmem:[#allocation3 + $0x18] sm:$0xff] }
  0x39   : > { %974 = vmatprep.subr.bf16.mxu0 %v1070_v19  ;;  %1004 = vmatprep.subr.bf16.mxu1 %v1070_v19  ;;  %v430_v40 = vld [vmem:[#allocation3 + $0x58] sm:$0xff]  ;;  %v420_v45 = vld [vmem:[#allocation3 + $0x8] sm:$0xff]  ;;  %v425_v57 = vld [vmem:[#allocation3 + $0x30] sm:$0xff] }
  0x3a   : > { %v428_v46 = vld [vmem:[#allocation3 + $0x48] sm:$0xff]  ;;  %v433_v58 = vld [vmem:[#allocation3 + $0x70] sm:$0xff]  ;;  %v423_v59 = vld [vmem:[#allocation3 + $0x20] sm:$0xff] }
  0x3b   : > { %v431_v60 = vld [vmem:[#allocation3 + $0x60] sm:$0xff]  ;;  %v426_v63 = vld [vmem:[#allocation3 + $0x38] sm:$0xff]  ;;  %v424_v5 = vld [vmem:[#allocation3 + $0x28] sm:$0xff] }
  0x3c   : > { %975 = vmatpush3.bf16.msra.mxu0 %v1070_v19  ;;  %1012 = vmatpush3.bf16.msra.mxu1 %v1070_v19  ;;  %v434_v0 = vld [vmem:[#allocation3 + $0x78] sm:$0xff]  ;;  %v432_v6 = vld [vmem:[#allocation3 + $0x68] sm:$0xff]  ;;  %v1277_v18 = vld [vmem:[%s1388_s2] ss:$0 sm:$0xff] (!%p948_p11) }
  0x3d   : > { %976 = vmatprep.subr.bf16.mxu0 %v1071_v20  ;;  %1005 = vmatprep.subr.bf16.mxu1 %v1071_v20  ;;  %v735_v19 = vld [vmem:[%s1389_s3] sm:$0xff] (!%p948_p11)  ;;  %v736_v22 = vld [vmem:[%s1389_s3 + $0x8] sm:$0xff] (!%p948_p11) }
  0x40   : > { %977 = vmatpush3.bf16.msra.mxu0 %v1071_v20  ;;  %1013 = vmatpush3.bf16.msra.mxu1 %v1071_v20 }
  0x41   : > { %978 = vmatprep.subr.bf16.mxu0 %v1072_v23  ;;  %1006 = vmatprep.subr.bf16.mxu1 %v1072_v23 }
  0x44   : > { %979 = vmatpush3.bf16.msra.mxu0 %v1072_v23  ;;  %1014 = vmatpush3.bf16.msra.mxu1 %v1072_v23 }
  0x45   : > { %980 = vmatprep.subr.bf16.mxu0 %v1073_v24  ;;  %1007 = vmatprep.subr.bf16.mxu1 %v1073_v24 }
  0x48   : > { %981 = vmatpush3.bf16.msra.mxu0 %v1073_v24  ;;  %1015 = vmatpush3.bf16.msra.mxu1 %v1073_v24 }
  0x49   : > { %982 = vmatprep.subr.bf16.mxu0 %v1074_v25  ;;  %1008 = vmatprep.subr.bf16.mxu1 %v1074_v25 }
  0x4c   : > { %983 = vmatpush3.bf16.msra.mxu0 %v1074_v25  ;;  %1016 = vmatpush3.bf16.msra.mxu1 %v1074_v25 }
  0x4d   : > { %984 = vmatprep.subr.bf16.mxu0 %v1075_v26  ;;  %1009 = vmatprep.subr.bf16.mxu1 %v1075_v26 }
  0x50   : > { %985 = vmatpush3.bf16.msra.mxu0 %v1075_v26  ;;  %1017 = vmatpush3.bf16.msra.mxu1 %v1075_v26  ;;  %v737_v26 = vld [vmem:[%s1389_s3 + $0x10] sm:$0xff] (!%p948_p11) }
  0x53   : > { %987 = vmatmul.mubr.bf16.vlgmr.msra.gmra.mrb[0].mxu0 %v1078_v27  ;;  %995 = vmatmul.mubr.bf16.vlgmr.msra.gmra.mrb[0].mxu1 %v1079_v28  ;;  %v738_v28 = vld [vmem:[%s1389_s3 + $0x18] sm:$0xff] (!%p948_p11) }
  0x54   : > { %990 = vmatprep.mubr.bf16.mxu0 %v1080_v29  ;;  %998 = vmatprep.mubr.bf16.mxu1 %v1081_v30 }
  0x5b   : > { %991 = vmatmul.mubr.bf16.gmra.mrb[4].mxu0 %v1082_v31  ;;  %999 = vmatmul.mubr.bf16.gmra.mrb[4].mxu1 %v1083_v32  ;;  %v739_v32 = vld [vmem:[%s1389_s3 + $0x20] sm:$0xff] (!%p948_p11) }
 0x126   : > { %v988_v37 = vpop.f32.mrb[0].mxu0  ;;  %v996_v38 = vpop.f32.mrb[0].mxu1 }
 0x127   : > { %v662_v41 = vadd.f32 %v988_v37, %v421_v33  ;;  %v670_v42 = vadd.f32 %v996_v38, %v429_v34  ;;  %v597_v43 = vpop.f32.mrb[1].mxu0  ;;  %v629_v44 = vpop.f32.mrb[1].mxu1  ;;  %v740_v38 = vld [vmem:[%s1389_s3 + $0x28] sm:$0xff] (!%p948_p11) }
 0x128   : > { %v660_v47 = vadd.f32 %v597_v43, %v419_v35  ;;  %v668_v48 = vadd.f32 %v629_v44, %v427_v36  ;;  %v989_v49 = vpop.f32.mrb[2].mxu0  ;;  %v997_v50 = vpop.f32.mrb[2].mxu1 }
 0x129   : > { %678 = vst [vmem:[#allocation3 + $0x10] sm:$0xff] %v662_v41  ;;  %686 = vst [vmem:[#allocation3 + $0x50] sm:$0xff] %v670_v42  ;;  %v663_v51 = vadd.f32 %v989_v49, %v422_v39  ;;  %v671_v52 = vadd.f32 %v997_v50, %v430_v40  ;;  %v600_v53 = vpop.f32.mrb[3].mxu0  ;;  %v632_v54 = vpop.f32.mrb[3].mxu1  ;;  %v741_v40 = vld [vmem:[%s1389_s3 + $0x30] sm:$0xff] (!%p948_p11) }
 0x12a   : > { %676 = vst [vmem:[#allocation3] sm:$0xff] %v660_v47  ;;  %684 = vst [vmem:[#allocation3 + $0x40] sm:$0xff] %v668_v48  ;;  %v661_v55 = vadd.f32 %v600_v53, %v420_v45  ;;  %v669_v56 = vadd.f32 %v632_v54, %v428_v46  ;;  %v742_v45 = vld [vmem:[%s1389_s3 + $0x38] sm:$0xff] (!%p948_p11)  ;;  %v744_v53 = vld [vmem:[%s1389_s3 + $0x48] sm:$0xff] (!%p948_p11) }
 0x12b   : > { %679 = vst [vmem:[#allocation3 + $0x18] sm:$0xff] %v663_v51  ;;  %687 = vst [vmem:[#allocation3 + $0x58] sm:$0xff] %v671_v52  ;;  %v743_v51 = vld [vmem:[%s1389_s3 + $0x40] sm:$0xff] (!%p948_p11) }
 0x12c   : > { %677 = vst [vmem:[#allocation3 + $0x8] sm:$0xff] %v661_v55  ;;  %685 = vst [vmem:[#allocation3 + $0x48] sm:$0xff] %v669_v56 }
 0x12e   : > { %v992_v61 = vpop.f32.mrb[4].mxu0  ;;  %v1000_v62 = vpop.f32.mrb[4].mxu1  ;;  %695 = sbr.rel (%p948_p11) target bundleno = 324 (0x144), region = 85 }
 0x12f   : > { %v666_v1 = vadd.f32 %v992_v61, %v425_v57  ;;  %v674_v2 = vadd.f32 %v1000_v62, %v433_v58  ;;  %v613_v3 = vpop.f32.mrb[5].mxu0  ;;  %v645_v4 = vpop.f32.mrb[5].mxu1 }
 0x130   : > { %v664_v7 = vadd.f32 %v613_v3, %v423_v59  ;;  %v672_v8 = vadd.f32 %v645_v4, %v431_v60  ;;  %v993_v9 = vpop.f32.mrb[6].mxu0  ;;  %v1001_v10 = vpop.f32.mrb[6].mxu1  ;;  %v698_v23 = vld [vmem:[#allocation3 + $0x10] sm:$0xff] (!%p948_p11)  ;;  %v747_v3 = vld [vmem:[%s1389_s3 + $0x60] sm:$0xff] (!%p948_p11) }
 0x131   : > { %682 = vst [vmem:[#allocation3 + $0x30] sm:$0xff] %v666_v1  ;;  %690 = vst [vmem:[#allocation3 + $0x70] sm:$0xff] %v674_v2  ;;  %v667_v11 = vadd.f32 %v993_v9, %v426_v63  ;;  %v675_v12 = vadd.f32 %v1001_v10, %v434_v0  ;;  %v616_v13 = vpop.f32.mrb[7].mxu0  ;;  %v648_v14 = vpop.f32.mrb[7].mxu1  ;;  %v696_v17 = vld [vmem:[#allocation3] sm:$0xff] (!%p948_p11)  ;;  %v721_v25 = vadd.f32 (!%p948_p11), %v1277_v18, %v698_v23  ;;  %v706_v58 = vld [vmem:[#allocation3 + $0x50] sm:$0xff] (!%p948_p11) }
 0x132   : > { %680 = vst [vmem:[#allocation3 + $0x20] sm:$0xff] %v664_v7  ;;  %688 = vst [vmem:[#allocation3 + $0x60] sm:$0xff] %v672_v8  ;;  %v665_v15 = vadd.f32 %v616_v13, %v424_v5  ;;  %v673_v16 = vadd.f32 %v648_v14, %v432_v6  ;;  %v719_v20 = vadd.f32 (!%p948_p11), %v1277_v18, %v696_v17  ;;  %v699_v27 = vld [vmem:[#allocation3 + $0x18] sm:$0xff] (!%p948_p11)  ;;  %v704_v46 = vld [vmem:[#allocation3 + $0x40] sm:$0xff] (!%p948_p11) }
 0x133   : > { %683 = vst [vmem:[#allocation3 + $0x38] sm:$0xff] %v667_v11  ;;  %691 = vst [vmem:[#allocation3 + $0x78] sm:$0xff] %v675_v12  ;;  %v697_v21 = vld [vmem:[#allocation3 + $0x8] sm:$0xff] (!%p948_p11)  ;;  %v722_v30 = vadd.f32 (!%p948_p11), %v1277_v18, %v699_v27  ;;  %v753_v35 = vadd.f32 (!%p948_p11), %v737_v26, %v721_v25  ;;  %v727_v57 = vadd.f32 (!%p948_p11), %v1277_v18, %v704_v46  ;;  %v745_v59 = vld [vmem:[%s1389_s3 + $0x50] sm:$0xff] (!%p948_p11) }
 0x134   : > { %681 = vst [vmem:[#allocation3 + $0x28] sm:$0xff] %v665_v15  ;;  %689 = vst [vmem:[#allocation3 + $0x68] sm:$0xff] %v673_v16  ;;  %v720_v24 = vadd.f32 (!%p948_p11), %v1277_v18, %v697_v21  ;;  %v751_v29 = vadd.f32 (!%p948_p11), %v735_v19, %v719_v20  ;;  %v705_v52 = vld [vmem:[#allocation3 + $0x48] sm:$0xff] (!%p948_p11)  ;;  %v707_v60 = vld [vmem:[#allocation3 + $0x58] sm:$0xff] (!%p948_p11)  ;;  %v729_v0 = vadd.f32 (!%p948_p11), %v1277_v18, %v706_v58 }
 0x135   : > { %v754_v42 = vadd.f32 %v738_v28, %v722_v30  ;;  %v769_v48 = vmax.f32 %v753_v35, 0.0  ;;  %v728_v63 = vadd.f32 %v1277_v18, %v705_v52  ;;  %v746_v1 = vld [vmem:[%s1389_s3 + $0x58] sm:$0xff]  ;;  %v759_v6 = vadd.f32 %v743_v51, %v727_v57  ;;  %v748_v9 = vld [vmem:[%s1389_s3 + $0x68] sm:$0xff]  ;;  %v749_v15 = vld [vmem:[%s1389_s3 + $0x70] sm:$0xff] }
 0x136   : > { %v752_v34 = vadd.f32 %v736_v22, %v720_v24  ;;  %v767_v41 = vmax.f32 %v751_v29, 0.0  ;;  %v730_v7 = vadd.f32 %v1277_v18, %v707_v60  ;;  %v761_v12 = vadd.f32 %v745_v59, %v729_v0  ;;  %v750_v26 = vld [vmem:[%s1389_s3 + $0x78] sm:$0xff] }
 0x137   : > { %v770_v54 = vmax.f32 %v754_v42, 0.0  ;;  %785 = vst [vmem:[#allocation3 + $0x10] sm:$0xff] %v769_v48  ;;  %v760_v11 = vadd.f32 %v744_v53, %v728_v63  ;;  %v775_v19 = vmax.f32 %v759_v6, 0.0 }
 0x138   : > { %v702_v39 = vld [vmem:[#allocation3 + $0x30] sm:$0xff]  ;;  %v768_v47 = vmax.f32 %v752_v34, 0.0  ;;  %783 = vst [vmem:[#allocation3] sm:$0xff] %v767_v41  ;;  %v762_v20 = vadd.f32 %v746_v1, %v730_v7  ;;  %v777_v23 = vmax.f32 %v761_v12, 0.0 }
 0x139   : > { %v700_v31 = vld [vmem:[#allocation3 + $0x20] sm:$0xff]  ;;  %v725_v43 = vadd.f32 %v1277_v18, %v702_v39  ;;  %786 = vst [vmem:[#allocation3 + $0x18] sm:$0xff] %v770_v54  ;;  %v710_v10 = vld [vmem:[#allocation3 + $0x70] sm:$0xff]  ;;  %v776_v22 = vmax.f32 %v760_v11, 0.0  ;;  %791 = vst [vmem:[#allocation3 + $0x40] sm:$0xff] %v775_v19 }
 0x13a   : > { %v723_v36 = vadd.f32 %v1277_v18, %v700_v31  ;;  %v703_v44 = vld [vmem:[#allocation3 + $0x38] sm:$0xff]  ;;  %784 = vst [vmem:[#allocation3 + $0x8] sm:$0xff] %v768_v47  ;;  %v708_v2 = vld [vmem:[#allocation3 + $0x60] sm:$0xff]  ;;  %v733_v21 = vadd.f32 %v1277_v18, %v710_v10  ;;  %v778_v27 = vmax.f32 %v762_v20, 0.0  ;;  %793 = vst [vmem:[#allocation3 + $0x50] sm:$0xff] %v777_v23 }
 0x13b   : > { %v701_v33 = vld [vmem:[#allocation3 + $0x28] sm:$0xff]  ;;  %v757_v55 = vadd.f32 %v741_v40, %v725_v43  ;;  %v726_v56 = vadd.f32 %v1277_v18, %v703_v44  ;;  %v731_v13 = vadd.f32 %v1277_v18, %v708_v2  ;;  %v711_v16 = vld [vmem:[#allocation3 + $0x78] sm:$0xff]  ;;  %792 = vst [vmem:[#allocation3 + $0x48] sm:$0xff] %v776_v22 }
 0x13c   : > { %v724_v37 = vadd.f32 %v1277_v18, %v701_v33  ;;  %v755_v49 = vadd.f32 %v739_v32, %v723_v36  ;;  %v709_v8 = vld [vmem:[#allocation3 + $0x68] sm:$0xff]  ;;  %v765_v28 = vadd.f32 %v749_v15, %v733_v21  ;;  %v734_v29 = vadd.f32 %v1277_v18, %v711_v16  ;;  %794 = vst [vmem:[#allocation3 + $0x58] sm:$0xff] %v778_v27 }
 0x13d   : > { %v773_v4 = vmax.f32 %v757_v55, 0.0  ;;  %v758_v5 = vadd.f32 %v742_v45, %v726_v56  ;;  %v732_v14 = vadd.f32 %v1277_v18, %v709_v8  ;;  %v763_v24 = vadd.f32 %v747_v3, %v731_v13 }
 0x13e   : > { %v756_v50 = vadd.f32 %v740_v38, %v724_v37  ;;  %v771_v61 = vmax.f32 %v755_v49, 0.0  ;;  %v781_v32 = vmax.f32 %v765_v28, 0.0  ;;  %v766_v33 = vadd.f32 %v750_v26, %v734_v29 }
 0x13f   : > { %789 = vst [vmem:[#allocation3 + $0x30] sm:$0xff] %v773_v4  ;;  %v774_v17 = vmax.f32 %v758_v5, 0.0  ;;  %v764_v25 = vadd.f32 %v748_v9, %v732_v14  ;;  %v779_v30 = vmax.f32 %v763_v24, 0.0 }
 0x140   : > { %v772_v62 = vmax.f32 %v756_v50, 0.0  ;;  %787 = vst [vmem:[#allocation3 + $0x20] sm:$0xff] %v771_v61  ;;  %797 = vst [vmem:[#allocation3 + $0x70] sm:$0xff] %v781_v32  ;;  %v782_v34 = vmax.f32 %v766_v33, 0.0 }
 0x141   : > { %790 = vst [vmem:[#allocation3 + $0x38] sm:$0xff] %v774_v17  ;;  %v780_v31 = vmax.f32 %v764_v25, 0.0  ;;  %795 = vst [vmem:[#allocation3 + $0x60] sm:$0xff] %v779_v30 }
 0x142   : > { %788 = vst [vmem:[#allocation3 + $0x28] sm:$0xff] %v772_v62  ;;  %798 = vst [vmem:[#allocation3 + $0x78] sm:$0xff] %v782_v34 }
 0x143   : > { %796 = vst [vmem:[#allocation3 + $0x68] sm:$0xff] %v780_v31 }
 0x144 PF: > { %p1345_p12 = scmp.eq.s32.totalorder %s920_s20, 8  ;;  %s1155_s9 = smov [#allocation3]  }
 0x145   : > { %s809_s10 = sshll.u32 %s1155_s9, 4  ;;  %s810_s10 = int_to_ptr.vmem [resolvable:$true] %s809_s10 }
 0x146   : > { %s1084_s11 = scalar_lea.vmem %s810_s10, 2048  ;;  %p1091_p2 = scmp.lt.s32.totalorder %s810_s10, %s810_s10 }
 0x147   : > { %p1085_p13 = scmp.ne.s32.totalorder %s810_s10, %s1084_s11  ;;  %p1092_p3 = scmp.lt.s32.totalorder %s1084_s11, %s1084_s11 }
 0x149   : > { %p1086_p0 = pnand %p1085_p13, %p1345_p12  ;;  %p1093_p4 = por %p1092_p3, %p1091_p2 }
 0x14b   : > { %p1087_p1 = pneg %p1086_p0 }
 0x14d   : > { %p1094_p5 = pnand %p1093_p4, %p1087_p1 }
 0x14f   : > { %1097 = shalt.err (!%p1094_p5)
}
 0x150   : > { %s1098_s20 = scalar_lea.hbm %s1390_s4, 2048 }
 0x151   : > { %p1099_p6 = scmp.ne.s32.totalorder %s1390_s4, %s1098_s20  ;;  %p1104_p9 = scmp.lt.u32.totalorder %s1098_s20, %s1390_s4 }
 0x153   : > { %p1100_p7 = pnand %p1099_p6, %p1345_p12 }
 0x155   : > { %p1101_p8 = pneg %p1100_p7 }
 0x157   : > { %p1106_p10 = pnand %p1104_p9, %p1101_p8 }
 0x159   : > { %1109 = shalt.err (!%p1106_p10)
}
 0x15a   : > { %s1156_s25 = smov 128   ;;  %s1157_s26 = smov 8  }
 0x15b   : > { %1019 = dma.vmem_to_hbm [thread:$0]  (%p1345_p12), %s810_s10, 2048, %s1390_s4, [#allocation4], %s1156_s25, %s1156_s25, %s1157_s26  }
 0x15c   : > { %1131 = dma.done.wait (%p1345_p12), [#allocation4], 2048  }
 0x15d   : > { %1133 = vsyncadd (%p1345_p12), [#allocation4], 4294965248 }
 0x15e PF: > { %s15_s19 = sadd.s32 1, %s1152_s19   ;;  %s1392_s15 = smov %s1140_s16 }
 0x15f   : > { %p12_p11 = scmp.ge.s32.totalorder %s15_s19, 11   ;;  %s1393_s16 = smov %s1219_s24 }
 0x160   : > { %s1394_s17 = smov %s1148_s18  ;;  %s1395_s18 = smov %s1397_s21 }
 0x161   :  { %14 = sbr.rel (!%p12_p11) target bundleno = 3 (0x3), region = 127 }
 0x168   :  { %825 = vsyncpa [#allocation4], 1 }
 0x169   :  { %827 = vsyncpa [#allocation4 + $0x1], 1 }

</bundles_post_ra>
